<compile_context>
chip_gen: v7x
topology: tpu7x:2x2x1
jax: 0.10.0
libtpu: 0.0.40
codegen_flags: <defaults>
</compile_context>

<pallas_src>
import jax
import jax.numpy as jnp
import numpy as np
from jax import lax
from jax.experimental import pallas as pl
from jax.experimental.pallas import tpu as pltpu


VMEM_LIMIT_BYTES = 48 * 1024 * 1024   # fits v7x (64 MiB phys), > v5e/v6e defaults
TILE_BUDGET_BYTES = 16 * 1024 * 1024  # target footprint for pipelined tiles


# ----------------------------------------------------------------------------
# helpers
# ----------------------------------------------------------------------------
def _round_up(x, m):
    return ((x + m - 1) // m) * m


def _choose_batch_block(Bp, cap=128):
    """Batch block: multiple of 8 dividing Bp (Bp is already a multiple of 8)."""
    if Bp <= cap:
        return Bp
    for bb in range(cap - cap % 8, 7, -8):
        if Bp % bb == 0:
            return bb
    return 8


def _choose_time_block(T, Bb, Hp, F, budget_bytes=TILE_BUDGET_BYTES, cap=64):
    """Largest time block (multiple of 8, <= cap) whose footprint fits the budget."""
    per_t = 4 * Bb * (2 * F + 2 * Hp + 4 * Hp)   # x(x2) + out(x2) + gx scratch, f32
    tb = max(8, min(budget_bytes // max(per_t, 1), cap))
    tb = (tb // 8) * 8
    tb = min(tb, _round_up(max(T, 1), 8))
    return max(tb, 8)


def _choose_row_block(n_rows, Hp, Lp, PDp, budget_bytes=TILE_BUDGET_BYTES, cap=1024):
    """Row block for the head kernel: multiple of 8 dividing n_rows, budget-capped."""
    per_row = 4 * (2 * Hp + Lp + 2 * PDp)        # in(x2) + mid + out(x2), f32
    rb = max(8, min(budget_bytes // max(per_row, 1), cap, n_rows))
    rb = (rb // 8) * 8
    while n_rows % rb != 0:                      # n_rows % 8 == 0 -> terminates at 8
        rb -= 8
    return rb


def _prep_gate_mat(w, H, Hp):
    """w: (rows, 4H), PyTorch gate order (i,f,g,o) -> reorder to (i,f,o,g), pad H->Hp."""
    rows = w.shape[0]
    w4 = w.reshape(rows, 4, H)
    w4 = jnp.take(w4, jnp.asarray([0, 1, 3, 2]), axis=1)
    w4 = jnp.pad(w4, ((0, 0), (0, 0), (0, Hp - H)))
    return w4.reshape(rows, 4 * Hp)


# ----------------------------------------------------------------------------
# Kernel 1: LSTM recurrence with fused input projection and fused h0/c0 init.
#   grid = (batch blocks ["parallel"], time blocks ["arbitrary"])
#   Gate column order (after wrapper-side reorder): i, f, o, g — each Hp wide.
# ----------------------------------------------------------------------------
def lstm_kernel(x_ref, pchd_ref, winit_ref, wih_ref, bias_ref, whh_ref,
                out_ref, h_sc, c_sc, gx_sc):
    Tb, Bb, F = x_ref.shape
    Hp = h_sc.shape[-1]

    # h0/c0 init, fused into the first time block of each batch block.
    @pl.when(pl.program_id(1) == 0)
    def _init():
        s = jnp.dot(pchd_ref[...], winit_ref[...],
                    preferred_element_type=jnp.float32)          # (Bb, 2*Hp)
        h_sc[...] = s[:, :Hp]
        c_sc[...] = s[:, Hp:]

    # Block-level input projection — one big matmul off the per-step serial path.
    xb = x_ref[...].reshape(Tb * Bb, F)
    gx = jnp.dot(xb, wih_ref[...], preferred_element_type=jnp.float32) + bias_ref[...]
    gx_sc[...] = gx.reshape(Tb, Bb, 4 * Hp)

    whh = whh_ref[...]                                           # (Hp, 4*Hp), f32

    def step(tt, carry):
        h, c = carry
        gates = gx_sc[tt] + jnp.dot(h, whh, preferred_element_type=jnp.float32)
        ifo = jax.nn.sigmoid(gates[:, :3 * Hp])                  # one EUP slab
        g = jnp.tanh(gates[:, 3 * Hp:])
        i = ifo[:, 0 * Hp:1 * Hp]
        f = ifo[:, 1 * Hp:2 * Hp]
        o = ifo[:, 2 * Hp:3 * Hp]
        c = f * c + i * g
        h = o * jnp.tanh(c)
        out_ref[tt] = h                                          # aligned (Bb, Hp) store
        return (h, c)

    h, c = lax.fori_loop(0, Tb, step, (h_sc[...], c_sc[...]),
                         unroll=min(int(Tb), 8))
    h_sc[...] = h
    c_sc[...] = c


# ----------------------------------------------------------------------------
# Kernel 2: linear -> (dropout) -> fused [place|head] projection (lane-dense).
#   bf16 MXU operands, f32 accumulation & biases.
# ----------------------------------------------------------------------------
def head_kernel(h_ref, wl_ref, bl_ref, wph_ref, bph_ref, out_ref):
    h = h_ref[...].astype(wl_ref.dtype)
    mid = (jnp.dot(h, wl_ref[...], preferred_element_type=jnp.float32)
           + bl_ref[...])
    # TODO(synk): dropout implemented as eval-mode identity (no random mask).
    out_ref[...] = (jnp.dot(mid.astype(wph_ref.dtype), wph_ref[...],
                            preferred_element_type=jnp.float32)
                    + bph_ref[...])


# ----------------------------------------------------------------------------
# Wrapper
# ----------------------------------------------------------------------------
def network_forward(params, input_tensor, place_cell_ground, head_cell_ground):
    B, T, F = input_tensor.shape
    H = params["Wcp"].shape[1]
    L = params["W_lin"].shape[0]
    P = params["W_place"].shape[0]
    D = params["W_head"].shape[0]

    f32, bf16 = jnp.float32, jnp.bfloat16
    Hp = _round_up(H, 128)            # lane-aligned hidden
    Lp = _round_up(L, 128)            # lane-aligned linear
    PD = P + D
    PDp = _round_up(PD, 128)          # lane-dense fused head output

    Bp = _round_up(B, 8)              # sublane-aligned batch
    Bb = _choose_batch_block(Bp)
    Tb = _choose_time_block(T, Bb, Hp, F)
    Tp = _round_up(T, Tb)             # time padded to a whole number of blocks
    Np = Tp * Bp

    # ---- one-time weight prep (wrapper-side, tiny) ----------------------
    wih_t = _prep_gate_mat(params["w_ih"].T, H, Hp)                    # (F, 4Hp) f32
    bias = _prep_gate_mat((params["b_ih"] + params["b_hh"]).reshape(1, 4 * H),
                          H, Hp)                                       # (1, 4Hp)
    whh_t = _prep_gate_mat(params["w_hh"].T, H, Hp)                    # (H, 4Hp)
    whh_t = jnp.pad(whh_t, ((0, Hp - H), (0, 0)))                      # (Hp, 4Hp) f32

    pad_h = lambda w: jnp.pad(w, ((0, 0), (0, Hp - H)))
    w_init = jnp.concatenate([
        jnp.concatenate([pad_h(params["Wcp"]), pad_h(params["Whp"])], axis=1),
        jnp.concatenate([pad_h(params["Wcd"]), pad_h(params["Whd"])], axis=1),
    ], axis=0)                                                         # (P+D, 2Hp) f32

    # Head weights as bf16 MXU operands (zero padding is exact in bf16).
    wl_t = jnp.pad(params["W_lin"].T, ((0, Hp - H), (0, Lp - L))).astype(bf16)
    bl = jnp.pad(params["b_lin"], (0, Lp - L)).reshape(1, Lp)          # f32
    w_ph = jnp.pad(jnp.concatenate([params["W_place"].T,
                                    params["W_head"].T], axis=1),
                   ((0, Lp - L), (0, PDp - PD))).astype(bf16)          # (Lp, PDp)
    b_ph = jnp.pad(jnp.concatenate([params["b_place"], params["b_head"]]),
                   (0, PDp - PD)).reshape(1, PDp)                      # (1, PDp) f32

    # ---- padded, time-major activations ---------------------------------
    x_tm = jnp.swapaxes(
        jnp.pad(input_tensor, ((0, Bp - B), (0, Tp - T), (0, 0))), 0, 1)   # (Tp, Bp, F)
    pc_hd = jnp.pad(jnp.concatenate([place_cell_ground, head_cell_ground], axis=1),
                    ((0, Bp - B), (0, 0)))                                 # (Bp, PD)

    # ---- LSTM recurrence (fused input projection; batch-parallel grid) ---
    lstm_cost = pl.CostEstimate(
        flops=int(2 * Np * (F + Hp) * 4 * Hp + 2 * Bp * PD * 2 * Hp),
        transcendentals=int(5 * Np * Hp),
        bytes_accessed=int(4 * (Np * (F + Hp) + Bp * PD + PD * 2 * Hp
                                + (F + Hp + 1) * 4 * Hp)))
    h_tm = pl.pallas_call(
        lstm_kernel,
        out_shape=jax.ShapeDtypeStruct((Tp, Bp, Hp), f32),
        grid_spec=pltpu.PrefetchScalarGridSpec(
            num_scalar_prefetch=0,
            grid=(Bp // Bb, Tp // Tb),
            in_specs=[pl.BlockSpec((Tb, Bb, F), lambda bb, tb: (tb, bb, 0)),
                      pl.BlockSpec((Bb, PD), lambda bb, tb: (bb, 0)),
                      pl.BlockSpec((PD, 2 * Hp), lambda bb, tb: (0, 0)),
                      pl.BlockSpec((F, 4 * Hp), lambda bb, tb: (0, 0)),
                      pl.BlockSpec((1, 4 * Hp), lambda bb, tb: (0, 0)),
                      pl.BlockSpec((Hp, 4 * Hp), lambda bb, tb: (0, 0))],
            out_specs=pl.BlockSpec((Tb, Bb, Hp), lambda bb, tb: (tb, bb, 0)),
            scratch_shapes=[pltpu.VMEM((Bb, Hp), f32),          # h
                            pltpu.VMEM((Bb, Hp), f32),          # c
                            pltpu.VMEM((Tb, Bb, 4 * Hp), f32)], # gates_x block
        ),
        compiler_params=pltpu.CompilerParams(
            dimension_semantics=("parallel", "arbitrary"),
            vmem_limit_bytes=VMEM_LIMIT_BYTES),
        cost_estimate=lstm_cost,
    )(x_tm, pc_hd, w_init, wih_t, bias, whh_t)

    # ---- linear + fused place/head heads (row-tiled, lane-dense output) --
    Rb = _choose_row_block(Np, Hp, Lp, PDp)
    head_cost = pl.CostEstimate(
        flops=int(2 * Np * (Hp * Lp + Lp * PDp)),
        transcendentals=0,
        bytes_accessed=int(4 * Np * (Hp + PDp) + 2 * (Hp * Lp + Lp * PDp)
                           + 4 * (Lp + PDp)))
    out_ph = pl.pallas_call(
        head_kernel,
        out_shape=jax.ShapeDtypeStruct((Np, PDp), f32),
        grid_spec=pltpu.PrefetchScalarGridSpec(
            num_scalar_prefetch=0,
            grid=(Np // Rb,),
            in_specs=[pl.BlockSpec((Rb, Hp), lambda r: (r, 0)),
                      pl.BlockSpec((Hp, Lp), lambda r: (0, 0)),
                      pl.BlockSpec((1, Lp), lambda r: (0, 0)),
                      pl.BlockSpec((Lp, PDp), lambda r: (0, 0)),
                      pl.BlockSpec((1, PDp), lambda r: (0, 0))],
            out_specs=pl.BlockSpec((Rb, PDp), lambda r: (r, 0)),
        ),
        compiler_params=pltpu.CompilerParams(
            dimension_semantics=("parallel",),
            vmem_limit_bytes=VMEM_LIMIT_BYTES),
        cost_estimate=head_cost,
    )(h_tm.reshape(Np, Hp), wl_t, bl, w_ph, b_ph)

    # Drop time/batch/lane padding; single small XLA transpose time-major ->
    # batch-major to match PyTorch's outputs.reshape(-1, H) row order.
    out_tm = out_ph.reshape(Tp, Bp, PDp)[:T, :B, :PD]
    out_bm = jnp.swapaxes(out_tm, 0, 1).reshape(B * T, PD)
    outputs_place = out_bm[:, :P]
    outputs_head = out_bm[:, P:]

    # Same return signature as the PyTorch module.
    return outputs_place, outputs_head, params["W_place"], params["W_head"]


# ----------------------------------------------------------------------------
# Pure-JAX reference (mirrors PyTorch semantics) for a correctness check
# ----------------------------------------------------------------------------
def reference_forward(params, x, pc, hd):
    h0 = pc @ params["Wcp"] + hd @ params["Wcd"]
    c0 = pc @ params["Whp"] + hd @ params["Whd"]
    wih, whh = params["w_ih"], params["w_hh"]
    b = params["b_ih"] + params["b_hh"]

    def step(carry, x_t):
        h, c = carry
        gates = x_t @ wih.T + h @ whh.T + b
        i, f, g, o = jnp.split(gates, 4, axis=-1)
        i, f, o = jax.nn.sigmoid(i), jax.nn.sigmoid(f), jax.nn.sigmoid(o)
        g = jnp.tanh(g)
        c = f * c + i * g
        h = o * jnp.tanh(c)
        return (h, c), h

    (_, _), hs = jax.lax.scan(step, (h0, c0), jnp.swapaxes(x, 0, 1))
    outs = jnp.swapaxes(hs, 0, 1).reshape(-1, params["Wcp"].shape[1])
    mid = outs @ params["W_lin"].T + params["b_lin"]
    place = mid @ params["W_place"].T + params["b_place"]
    head = mid @ params["W_head"].T + params["b_head"]
    return place, head


# ----------------------------------------------------------------------------
def make_params(key, place_units, head_units, lstm_units, linear_units,
                num_features):
    ks = jax.random.split(key, 14)
    H = lstm_units
    u = lambda k, s, lim: jax.random.uniform(k, s, jnp.float32, -lim, lim)
    lim_lstm = 1.0 / np.sqrt(H)
    return {
        # nn.Parameter(torch.rand(...)) -> U[0, 1)
        "Wcp": jax.random.uniform(ks[0], (place_units, H), jnp.float32),
        "Wcd": jax.random.uniform(ks[1], (head_units, H), jnp.float32),
        "Whp": jax.random.uniform(ks[2], (place_units, H), jnp.float32),
        "Whd": jax.random.uniform(ks[3], (head_units, H), jnp.float32),
        # nn.LSTM(num_features, H)
        "w_ih": u(ks[4], (4 * H, num_features), lim_lstm),
        "w_hh": u(ks[5], (4 * H, H), lim_lstm),
        "b_ih": u(ks[6], (4 * H,), lim_lstm),
        "b_hh": u(ks[7], (4 * H,), lim_lstm),
        # nn.Linear(H, linear_units)
        "W_lin": u(ks[8], (linear_units, H), 1.0 / np.sqrt(H)),
        "b_lin": u(ks[9], (linear_units,), 1.0 / np.sqrt(H)),
        # nn.Linear(linear_units, place_units)
        "W_place": u(ks[10], (place_units, linear_units), 1.0 / np.sqrt(linear_units)),
        "b_place": u(ks[11], (place_units,), 1.0 / np.sqrt(linear_units)),
        # nn.Linear(linear_units, head_units)
        "W_head": u(ks[12], (head_units, linear_units), 1.0 / np.sqrt(linear_units)),
        "b_head": u(ks[13], (head_units,), 1.0 / np.sqrt(linear_units)),
    }


if __name__ == "__main__":
    # Small, forward-consistent shapes
    B, T = 2, 8
    place_units, head_units = 32, 16
    lstm_units, linear_units, num_features = 32, 64, 8

    key = jax.random.PRNGKey(0)
    kp, kx, kpc, khd = jax.random.split(key, 4)
    params = make_params(kp, place_units, head_units, lstm_units,
                         linear_units, num_features)

    x = jax.random.normal(kx, (B, T, num_features), jnp.float32)
    pc = jax.random.normal(kpc, (B, place_units), jnp.float32)
    hd = jax.random.normal(khd, (B, head_units), jnp.float32)

    out_place, out_head, w_place, w_head = network_forward(params, x, pc, hd)
    jax.block_until_ready((out_place, out_head, w_place, w_head))

    # Tolerance accounts for bf16 MXU operands in the head kernel (f32 accumulate);
    # the recurrent path is kept f32 so the error does not compound over T.
    ref_place, ref_head = reference_forward(params, x, pc, hd)
    np.testing.assert_allclose(np.asarray(out_place), np.asarray(ref_place),
                               rtol=2e-2, atol=2e-2)
    np.testing.assert_allclose(np.asarray(out_head), np.asarray(ref_head),
                               rtol=2e-2, atol=2e-2)

    print("KERNEL_OK")
</pallas_src>

<mosaic_0001>
module attributes {stable_mosaic.version = 11 : i64} {
  func.func @lstm_kernel(%arg0: i32, %arg1: i32, %arg2: memref<8x8x8xf32, #tpu.memory_space<vmem>>, %arg3: memref<8x48xf32, #tpu.memory_space<vmem>>, %arg4: memref<48x256xf32, #tpu.memory_space<vmem>>, %arg5: memref<8x512xf32, #tpu.memory_space<vmem>>, %arg6: memref<1x512xf32, #tpu.memory_space<vmem>>, %arg7: memref<128x512xf32, #tpu.memory_space<vmem>>, %arg8: memref<8x8x128xf32, #tpu.memory_space<vmem>>, %arg9: memref<8x128xf32, #tpu.memory_space<vmem>>, %arg10: memref<8x128xf32, #tpu.memory_space<vmem>>, %arg11: memref<8x8x512xf32, #tpu.memory_space<vmem>>) attributes {dimension_semantics = [#tpu.dimension_semantics<parallel>, #tpu.dimension_semantics<arbitrary>], iteration_bounds = array<i64: 1, 1>, scalar_prefetch = 0 : i64, scratch_operands = 3 : i64, tpu.core_type = #tpu.core_type<tc>, window_params = [{transform_indices = @transform_0, window_bounds = array<i64: 8, 8, 8>}, {transform_indices = @transform_1, window_bounds = array<i64: 8, 48>}, {pipeline_mode = #tpu.pipeline_mode<synchronous>, transform_indices = @transform_2, window_bounds = array<i64: 48, 256>}, {pipeline_mode = #tpu.pipeline_mode<synchronous>, transform_indices = @transform_3, window_bounds = array<i64: 8, 512>}, {pipeline_mode = #tpu.pipeline_mode<synchronous>, transform_indices = @transform_4, window_bounds = array<i64: 1, 512>}, {pipeline_mode = #tpu.pipeline_mode<synchronous>, transform_indices = @transform_5, window_bounds = array<i64: 128, 512>}, {transform_indices = @transform_6, window_bounds = array<i64: 8, 8, 128>}]} {
    %c0_i32 = arith.constant 0 : i32
    %0 = arith.cmpi eq, %arg1, %c0_i32 : i32
    %1 = arith.extui %0 : i1 to i32
    %c0_i32_0 = arith.constant 0 : i32
    %2 = arith.cmpi ne, %1, %c0_i32_0 : i32
    scf.if %2 {
      %c0_69 = arith.constant 0 : index
      %c0_70 = arith.constant 0 : index
      %217 = vector.load %arg3[%c0_69, %c0_70] : memref<8x48xf32, #tpu.memory_space<vmem>>, vector<8x48xf32>
      %c0_71 = arith.constant 0 : index
      %c0_72 = arith.constant 0 : index
      %218 = vector.load %arg4[%c0_71, %c0_72] : memref<48x256xf32, #tpu.memory_space<vmem>>, vector<48x256xf32>
      %cst_73 = arith.constant dense<0.000000e+00> : vector<8x256xf32>
      %219 = tpu.matmul %217, %218, %cst_73 {dimension_numbers = #tpu.dot_dimension_numbers<[1], [0], [0], [1], [0, 0, 1, 1], [], []>} : vector<8x48xf32>, vector<48x256xf32>, vector<8x256xf32> -> vector<8x256xf32>
      %220 = vector.extract_strided_slice %219 {offsets = [0, 0], sizes = [8, 128], strides = [1, 1]} : vector<8x256xf32> to vector<8x128xf32>
      %c0_74 = arith.constant 0 : index
      %c0_75 = arith.constant 0 : index
      %221 = vector.load %arg9[%c0_74, %c0_75] : memref<8x128xf32, #tpu.memory_space<vmem>>, vector<8x128xf32>
      tpu.vector_store %arg9[%c0_74, %c0_75], %220 {strides = array<i32>} : memref<8x128xf32, #tpu.memory_space<vmem>>, vector<8x128xf32>,
      %222 = vector.extract_strided_slice %219 {offsets = [0, 128], sizes = [8, 128], strides = [1, 1]} : vector<8x256xf32> to vector<8x128xf32>
      %c0_76 = arith.constant 0 : index
      %c0_77 = arith.constant 0 : index
      %223 = vector.load %arg10[%c0_76, %c0_77] : memref<8x128xf32, #tpu.memory_space<vmem>>, vector<8x128xf32>
      tpu.vector_store %arg10[%c0_76, %c0_77], %222 {strides = array<i32>} : memref<8x128xf32, #tpu.memory_space<vmem>>, vector<8x128xf32>,
    } else {
    }
    %c0 = arith.constant 0 : index
    %c0_1 = arith.constant 0 : index
    %c0_2 = arith.constant 0 : index
    %3 = vector.load %arg2[%c0, %c0_1, %c0_2] : memref<8x8x8xf32, #tpu.memory_space<vmem>>, vector<8x8x8xf32>
    %4 = vector.shape_cast %3 : vector<8x8x8xf32> to vector<64x8xf32>
    %c0_3 = arith.constant 0 : index
    %c0_4 = arith.constant 0 : index
    %5 = vector.load %arg5[%c0_3, %c0_4] : memref<8x512xf32, #tpu.memory_space<vmem>>, vector<8x512xf32>
    %cst = arith.constant dense<0.000000e+00> : vector<64x512xf32>
    %6 = tpu.matmul %4, %5, %cst {dimension_numbers = #tpu.dot_dimension_numbers<[1], [0], [0], [1], [0, 0, 1, 1], [], []>} : vector<64x8xf32>, vector<8x512xf32>, vector<64x512xf32> -> vector<64x512xf32>
    %c0_5 = arith.constant 0 : index
    %c0_6 = arith.constant 0 : index
    %7 = vector.load %arg6[%c0_5, %c0_6] : memref<1x512xf32, #tpu.memory_space<vmem>>, vector<1x512xf32>
    %8 = vector.broadcast %7 : vector<1x512xf32> to vector<64x512xf32>
    %9 = arith.addf %6, %8 : vector<64x512xf32>
    %10 = vector.shape_cast %9 : vector<64x512xf32> to vector<8x8x512xf32>
    %c0_7 = arith.constant 0 : index
    %c0_8 = arith.constant 0 : index
    %c0_9 = arith.constant 0 : index
    %11 = vector.load %arg11[%c0_7, %c0_8, %c0_9] : memref<8x8x512xf32, #tpu.memory_space<vmem>>, vector<8x8x512xf32>
    tpu.vector_store %arg11[%c0_7, %c0_8, %c0_9], %10 {strides = array<i32>} : memref<8x8x512xf32, #tpu.memory_space<vmem>>, vector<8x8x512xf32>,
    %c0_10 = arith.constant 0 : index
    %c0_11 = arith.constant 0 : index
    %12 = vector.load %arg7[%c0_10, %c0_11] : memref<128x512xf32, #tpu.memory_space<vmem>>, vector<128x512xf32>
    %c0_12 = arith.constant 0 : index
    %c0_13 = arith.constant 0 : index
    %13 = vector.load %arg9[%c0_12, %c0_13] : memref<8x128xf32, #tpu.memory_space<vmem>>, vector<8x128xf32>
    %c0_14 = arith.constant 0 : index
    %c0_15 = arith.constant 0 : index
    %14 = vector.load %arg10[%c0_14, %c0_15] : memref<8x128xf32, #tpu.memory_space<vmem>>, vector<8x128xf32>
    %c0_i32_16 = arith.constant 0 : i32
    %15 = arith.index_cast %c0_i32_16 : i32 to index
    %c0_17 = arith.constant 0 : index
    %c0_18 = arith.constant 0 : index
    %16 = vector.load %arg11[%15, %c0_17, %c0_18] : memref<8x8x512xf32, #tpu.memory_space<vmem>>, vector<1x8x512xf32>
    %17 = vector.shape_cast %16 : vector<1x8x512xf32> to vector<8x512xf32>
    %cst_19 = arith.constant dense<0.000000e+00> : vector<8x512xf32>
    %18 = tpu.matmul %13, %12, %cst_19 {dimension_numbers = #tpu.dot_dimension_numbers<[1], [0], [0], [1], [0, 0, 1, 1], [], []>} : vector<8x128xf32>, vector<128x512xf32>, vector<8x512xf32> -> vector<8x512xf32>
    %19 = arith.addf %17, %18 : vector<8x512xf32>
    %20 = vector.extract_strided_slice %19 {offsets = [0, 0], sizes = [8, 384], strides = [1, 1]} : vector<8x512xf32> to vector<8x384xf32>
    %21 = arith.negf %20 : vector<8x384xf32>
    %22 = math.exp %21 : vector<8x384xf32>
    %cst_20 = arith.constant 1.000000e+00 : f32
    %23 = vector.broadcast %cst_20 : f32 to vector<8x384xf32>
    %24 = arith.addf %23, %22 : vector<8x384xf32>
    %25 = arith.divf %23, %24 : vector<8x384xf32>
    %26 = vector.extract_strided_slice %19 {offsets = [0, 384], sizes = [8, 128], strides = [1, 1]} : vector<8x512xf32> to vector<8x128xf32>
    %27 = math.tanh %26 : vector<8x128xf32>
    %28 = vector.extract_strided_slice %25 {offsets = [0, 0], sizes = [8, 128], strides = [1, 1]} : vector<8x384xf32> to vector<8x128xf32>
    %29 = vector.extract_strided_slice %25 {offsets = [0, 128], sizes = [8, 128], strides = [1, 1]} : vector<8x384xf32> to vector<8x128xf32>
    %30 = vector.extract_strided_slice %25 {offsets = [0, 256], sizes = [8, 128], strides = [1, 1]} : vector<8x384xf32> to vector<8x128xf32>
    %31 = arith.mulf %29, %14 : vector<8x128xf32>
    %32 = arith.mulf %28, %27 : vector<8x128xf32>
    %33 = arith.addf %31, %32 : vector<8x128xf32>
    %34 = math.tanh %33 : vector<8x128xf32>
    %35 = arith.mulf %30, %34 : vector<8x128xf32>
    %36 = arith.index_cast %c0_i32_16 : i32 to index
    %c0_21 = arith.constant 0 : index
    %c0_22 = arith.constant 0 : index
    %37 = vector.load %arg8[%36, %c0_21, %c0_22] : memref<8x8x128xf32, #tpu.memory_space<vmem>>, vector<1x8x128xf32>
    %38 = vector.shape_cast %37 : vector<1x8x128xf32> to vector<8x128xf32>
    %39 = vector.shape_cast %35 : vector<8x128xf32> to vector<1x8x128xf32>
    tpu.vector_store %arg8[%36, %c0_21, %c0_22], %39 {strides = array<i32>} : memref<8x8x128xf32, #tpu.memory_space<vmem>>, vector<1x8x128xf32>,
    %c1_i32 = arith.constant 1 : i32
    %40 = arith.index_cast %c1_i32 : i32 to index
    %c0_23 = arith.constant 0 : index
    %c0_24 = arith.constant 0 : index
    %41 = vector.load %arg11[%40, %c0_23, %c0_24] : memref<8x8x512xf32, #tpu.memory_space<vmem>>, vector<1x8x512xf32>
    %42 = vector.shape_cast %41 : vector<1x8x512xf32> to vector<8x512xf32>
    %cst_25 = arith.constant dense<0.000000e+00> : vector<8x512xf32>
    %43 = tpu.matmul %35, %12, %cst_25 {dimension_numbers = #tpu.dot_dimension_numbers<[1], [0], [0], [1], [0, 0, 1, 1], [], []>} : vector<8x128xf32>, vector<128x512xf32>, vector<8x512xf32> -> vector<8x512xf32>
    %44 = arith.addf %42, %43 : vector<8x512xf32>
    %45 = vector.extract_strided_slice %44 {offsets = [0, 0], sizes = [8, 384], strides = [1, 1]} : vector<8x512xf32> to vector<8x384xf32>
    %46 = arith.negf %45 : vector<8x384xf32>
    %47 = math.exp %46 : vector<8x384xf32>
    %cst_26 = arith.constant 1.000000e+00 : f32
    %48 = vector.broadcast %cst_26 : f32 to vector<8x384xf32>
    %49 = arith.addf %48, %47 : vector<8x384xf32>
    %50 = arith.divf %48, %49 : vector<8x384xf32>
    %51 = vector.extract_strided_slice %44 {offsets = [0, 384], sizes = [8, 128], strides = [1, 1]} : vector<8x512xf32> to vector<8x128xf32>
    %52 = math.tanh %51 : vector<8x128xf32>
    %53 = vector.extract_strided_slice %50 {offsets = [0, 0], sizes = [8, 128], strides = [1, 1]} : vector<8x384xf32> to vector<8x128xf32>
    %54 = vector.extract_strided_slice %50 {offsets = [0, 128], sizes = [8, 128], strides = [1, 1]} : vector<8x384xf32> to vector<8x128xf32>
    %55 = vector.extract_strided_slice %50 {offsets = [0, 256], sizes = [8, 128], strides = [1, 1]} : vector<8x384xf32> to vector<8x128xf32>
    %56 = arith.mulf %54, %33 : vector<8x128xf32>
    %57 = arith.mulf %53, %52 : vector<8x128xf32>
    %58 = arith.addf %56, %57 : vector<8x128xf32>
    %59 = math.tanh %58 : vector<8x128xf32>
    %60 = arith.mulf %55, %59 : vector<8x128xf32>
    %61 = arith.index_cast %c1_i32 : i32 to index
    %c0_27 = arith.constant 0 : index
    %c0_28 = arith.constant 0 : index
    %62 = vector.load %arg8[%61, %c0_27, %c0_28] : memref<8x8x128xf32, #tpu.memory_space<vmem>>, vector<1x8x128xf32>
    %63 = vector.shape_cast %62 : vector<1x8x128xf32> to vector<8x128xf32>
    %64 = vector.shape_cast %60 : vector<8x128xf32> to vector<1x8x128xf32>
    tpu.vector_store %arg8[%61, %c0_27, %c0_28], %64 {strides = array<i32>} : memref<8x8x128xf32, #tpu.memory_space<vmem>>, vector<1x8x128xf32>,
    %c2_i32 = arith.constant 2 : i32
    %65 = arith.index_cast %c2_i32 : i32 to index
    %c0_29 = arith.constant 0 : index
    %c0_30 = arith.constant 0 : index
    %66 = vector.load %arg11[%65, %c0_29, %c0_30] : memref<8x8x512xf32, #tpu.memory_space<vmem>>, vector<1x8x512xf32>
    %67 = vector.shape_cast %66 : vector<1x8x512xf32> to vector<8x512xf32>
    %cst_31 = arith.constant dense<0.000000e+00> : vector<8x512xf32>
    %68 = tpu.matmul %60, %12, %cst_31 {dimension_numbers = #tpu.dot_dimension_numbers<[1], [0], [0], [1], [0, 0, 1, 1], [], []>} : vector<8x128xf32>, vector<128x512xf32>, vector<8x512xf32> -> vector<8x512xf32>
    %69 = arith.addf %67, %68 : vector<8x512xf32>
    %70 = vector.extract_strided_slice %69 {offsets = [0, 0], sizes = [8, 384], strides = [1, 1]} : vector<8x512xf32> to vector<8x384xf32>
    %71 = arith.negf %70 : vector<8x384xf32>
    %72 = math.exp %71 : vector<8x384xf32>
    %cst_32 = arith.constant 1.000000e+00 : f32
    %73 = vector.broadcast %cst_32 : f32 to vector<8x384xf32>
    %74 = arith.addf %73, %72 : vector<8x384xf32>
    %75 = arith.divf %73, %74 : vector<8x384xf32>
    %76 = vector.extract_strided_slice %69 {offsets = [0, 384], sizes = [8, 128], strides = [1, 1]} : vector<8x512xf32> to vector<8x128xf32>
    %77 = math.tanh %76 : vector<8x128xf32>
    %78 = vector.extract_strided_slice %75 {offsets = [0, 0], sizes = [8, 128], strides = [1, 1]} : vector<8x384xf32> to vector<8x128xf32>
    %79 = vector.extract_strided_slice %75 {offsets = [0, 128], sizes = [8, 128], strides = [1, 1]} : vector<8x384xf32> to vector<8x128xf32>
    %80 = vector.extract_strided_slice %75 {offsets = [0, 256], sizes = [8, 128], strides = [1, 1]} : vector<8x384xf32> to vector<8x128xf32>
    %81 = arith.mulf %79, %58 : vector<8x128xf32>
    %82 = arith.mulf %78, %77 : vector<8x128xf32>
    %83 = arith.addf %81, %82 : vector<8x128xf32>
    %84 = math.tanh %83 : vector<8x128xf32>
    %85 = arith.mulf %80, %84 : vector<8x128xf32>
    %86 = arith.index_cast %c2_i32 : i32 to index
    %c0_33 = arith.constant 0 : index
    %c0_34 = arith.constant 0 : index
    %87 = vector.load %arg8[%86, %c0_33, %c0_34] : memref<8x8x128xf32, #tpu.memory_space<vmem>>, vector<1x8x128xf32>
    %88 = vector.shape_cast %87 : vector<1x8x128xf32> to vector<8x128xf32>
    %89 = vector.shape_cast %85 : vector<8x128xf32> to vector<1x8x128xf32>
    tpu.vector_store %arg8[%86, %c0_33, %c0_34], %89 {strides = array<i32>} : memref<8x8x128xf32, #tpu.memory_space<vmem>>, vector<1x8x128xf32>,
    %c3_i32 = arith.constant 3 : i32
    %90 = arith.index_cast %c3_i32 : i32 to index
    %c0_35 = arith.constant 0 : index
    %c0_36 = arith.constant 0 : index
    %91 = vector.load %arg11[%90, %c0_35, %c0_36] : memref<8x8x512xf32, #tpu.memory_space<vmem>>, vector<1x8x512xf32>
    %92 = vector.shape_cast %91 : vector<1x8x512xf32> to vector<8x512xf32>
    %cst_37 = arith.constant dense<0.000000e+00> : vector<8x512xf32>
    %93 = tpu.matmul %85, %12, %cst_37 {dimension_numbers = #tpu.dot_dimension_numbers<[1], [0], [0], [1], [0, 0, 1, 1], [], []>} : vector<8x128xf32>, vector<128x512xf32>, vector<8x512xf32> -> vector<8x512xf32>
    %94 = arith.addf %92, %93 : vector<8x512xf32>
    %95 = vector.extract_strided_slice %94 {offsets = [0, 0], sizes = [8, 384], strides = [1, 1]} : vector<8x512xf32> to vector<8x384xf32>
    %96 = arith.negf %95 : vector<8x384xf32>
    %97 = math.exp %96 : vector<8x384xf32>
    %cst_38 = arith.constant 1.000000e+00 : f32
    %98 = vector.broadcast %cst_38 : f32 to vector<8x384xf32>
    %99 = arith.addf %98, %97 : vector<8x384xf32>
    %100 = arith.divf %98, %99 : vector<8x384xf32>
    %101 = vector.extract_strided_slice %94 {offsets = [0, 384], sizes = [8, 128], strides = [1, 1]} : vector<8x512xf32> to vector<8x128xf32>
    %102 = math.tanh %101 : vector<8x128xf32>
    %103 = vector.extract_strided_slice %100 {offsets = [0, 0], sizes = [8, 128], strides = [1, 1]} : vector<8x384xf32> to vector<8x128xf32>
    %104 = vector.extract_strided_slice %100 {offsets = [0, 128], sizes = [8, 128], strides = [1, 1]} : vector<8x384xf32> to vector<8x128xf32>
    %105 = vector.extract_strided_slice %100 {offsets = [0, 256], sizes = [8, 128], strides = [1, 1]} : vector<8x384xf32> to vector<8x128xf32>
    %106 = arith.mulf %104, %83 : vector<8x128xf32>
    %107 = arith.mulf %103, %102 : vector<8x128xf32>
    %108 = arith.addf %106, %107 : vector<8x128xf32>
    %109 = math.tanh %108 : vector<8x128xf32>
    %110 = arith.mulf %105, %109 : vector<8x128xf32>
    %111 = arith.index_cast %c3_i32 : i32 to index
    %c0_39 = arith.constant 0 : index
    %c0_40 = arith.constant 0 : index
    %112 = vector.load %arg8[%111, %c0_39, %c0_40] : memref<8x8x128xf32, #tpu.memory_space<vmem>>, vector<1x8x128xf32>
    %113 = vector.shape_cast %112 : vector<1x8x128xf32> to vector<8x128xf32>
    %114 = vector.shape_cast %110 : vector<8x128xf32> to vector<1x8x128xf32>
    tpu.vector_store %arg8[%111, %c0_39, %c0_40], %114 {strides = array<i32>} : memref<8x8x128xf32, #tpu.memory_space<vmem>>, vector<1x8x128xf32>,
    %c4_i32 = arith.constant 4 : i32
    %115 = arith.index_cast %c4_i32 : i32 to index
    %c0_41 = arith.constant 0 : index
    %c0_42 = arith.constant 0 : index
    %116 = vector.load %arg11[%115, %c0_41, %c0_42] : memref<8x8x512xf32, #tpu.memory_space<vmem>>, vector<1x8x512xf32>
    %117 = vector.shape_cast %116 : vector<1x8x512xf32> to vector<8x512xf32>
    %cst_43 = arith.constant dense<0.000000e+00> : vector<8x512xf32>
    %118 = tpu.matmul %110, %12, %cst_43 {dimension_numbers = #tpu.dot_dimension_numbers<[1], [0], [0], [1], [0, 0, 1, 1], [], []>} : vector<8x128xf32>, vector<128x512xf32>, vector<8x512xf32> -> vector<8x512xf32>
    %119 = arith.addf %117, %118 : vector<8x512xf32>
    %120 = vector.extract_strided_slice %119 {offsets = [0, 0], sizes = [8, 384], strides = [1, 1]} : vector<8x512xf32> to vector<8x384xf32>
    %121 = arith.negf %120 : vector<8x384xf32>
    %122 = math.exp %121 : vector<8x384xf32>
    %cst_44 = arith.constant 1.000000e+00 : f32
    %123 = vector.broadcast %cst_44 : f32 to vector<8x384xf32>
    %124 = arith.addf %123, %122 : vector<8x384xf32>
    %125 = arith.divf %123, %124 : vector<8x384xf32>
    %126 = vector.extract_strided_slice %119 {offsets = [0, 384], sizes = [8, 128], strides = [1, 1]} : vector<8x512xf32> to vector<8x128xf32>
    %127 = math.tanh %126 : vector<8x128xf32>
    %128 = vector.extract_strided_slice %125 {offsets = [0, 0], sizes = [8, 128], strides = [1, 1]} : vector<8x384xf32> to vector<8x128xf32>
    %129 = vector.extract_strided_slice %125 {offsets = [0, 128], sizes = [8, 128], strides = [1, 1]} : vector<8x384xf32> to vector<8x128xf32>
    %130 = vector.extract_strided_slice %125 {offsets = [0, 256], sizes = [8, 128], strides = [1, 1]} : vector<8x384xf32> to vector<8x128xf32>
    %131 = arith.mulf %129, %108 : vector<8x128xf32>
    %132 = arith.mulf %128, %127 : vector<8x128xf32>
    %133 = arith.addf %131, %132 : vector<8x128xf32>
    %134 = math.tanh %133 : vector<8x128xf32>
    %135 = arith.mulf %130, %134 : vector<8x128xf32>
    %136 = arith.index_cast %c4_i32 : i32 to index
    %c0_45 = arith.constant 0 : index
    %c0_46 = arith.constant 0 : index
    %137 = vector.load %arg8[%136, %c0_45, %c0_46] : memref<8x8x128xf32, #tpu.memory_space<vmem>>, vector<1x8x128xf32>
    %138 = vector.shape_cast %137 : vector<1x8x128xf32> to vector<8x128xf32>
    %139 = vector.shape_cast %135 : vector<8x128xf32> to vector<1x8x128xf32>
    tpu.vector_store %arg8[%136, %c0_45, %c0_46], %139 {strides = array<i32>} : memref<8x8x128xf32, #tpu.memory_space<vmem>>, vector<1x8x128xf32>,
    %c5_i32 = arith.constant 5 : i32
    %140 = arith.index_cast %c5_i32 : i32 to index
    %c0_47 = arith.constant 0 : index
    %c0_48 = arith.constant 0 : index
    %141 = vector.load %arg11[%140, %c0_47, %c0_48] : memref<8x8x512xf32, #tpu.memory_space<vmem>>, vector<1x8x512xf32>
    %142 = vector.shape_cast %141 : vector<1x8x512xf32> to vector<8x512xf32>
    %cst_49 = arith.constant dense<0.000000e+00> : vector<8x512xf32>
    %143 = tpu.matmul %135, %12, %cst_49 {dimension_numbers = #tpu.dot_dimension_numbers<[1], [0], [0], [1], [0, 0, 1, 1], [], []>} : vector<8x128xf32>, vector<128x512xf32>, vector<8x512xf32> -> vector<8x512xf32>
    %144 = arith.addf %142, %143 : vector<8x512xf32>
    %145 = vector.extract_strided_slice %144 {offsets = [0, 0], sizes = [8, 384], strides = [1, 1]} : vector<8x512xf32> to vector<8x384xf32>
    %146 = arith.negf %145 : vector<8x384xf32>
    %147 = math.exp %146 : vector<8x384xf32>
    %cst_50 = arith.constant 1.000000e+00 : f32
    %148 = vector.broadcast %cst_50 : f32 to vector<8x384xf32>
    %149 = arith.addf %148, %147 : vector<8x384xf32>
    %150 = arith.divf %148, %149 : vector<8x384xf32>
    %151 = vector.extract_strided_slice %144 {offsets = [0, 384], sizes = [8, 128], strides = [1, 1]} : vector<8x512xf32> to vector<8x128xf32>
    %152 = math.tanh %151 : vector<8x128xf32>
    %153 = vector.extract_strided_slice %150 {offsets = [0, 0], sizes = [8, 128], strides = [1, 1]} : vector<8x384xf32> to vector<8x128xf32>
    %154 = vector.extract_strided_slice %150 {offsets = [0, 128], sizes = [8, 128], strides = [1, 1]} : vector<8x384xf32> to vector<8x128xf32>
    %155 = vector.extract_strided_slice %150 {offsets = [0, 256], sizes = [8, 128], strides = [1, 1]} : vector<8x384xf32> to vector<8x128xf32>
    %156 = arith.mulf %154, %133 : vector<8x128xf32>
    %157 = arith.mulf %153, %152 : vector<8x128xf32>
    %158 = arith.addf %156, %157 : vector<8x128xf32>
    %159 = math.tanh %158 : vector<8x128xf32>
    %160 = arith.mulf %155, %159 : vector<8x128xf32>
    %161 = arith.index_cast %c5_i32 : i32 to index
    %c0_51 = arith.constant 0 : index
    %c0_52 = arith.constant 0 : index
    %162 = vector.load %arg8[%161, %c0_51, %c0_52] : memref<8x8x128xf32, #tpu.memory_space<vmem>>, vector<1x8x128xf32>
    %163 = vector.shape_cast %162 : vector<1x8x128xf32> to vector<8x128xf32>
    %164 = vector.shape_cast %160 : vector<8x128xf32> to vector<1x8x128xf32>
    tpu.vector_store %arg8[%161, %c0_51, %c0_52], %164 {strides = array<i32>} : memref<8x8x128xf32, #tpu.memory_space<vmem>>, vector<1x8x128xf32>,
    %c6_i32 = arith.constant 6 : i32
    %165 = arith.index_cast %c6_i32 : i32 to index
    %c0_53 = arith.constant 0 : index
    %c0_54 = arith.constant 0 : index
    %166 = vector.load %arg11[%165, %c0_53, %c0_54] : memref<8x8x512xf32, #tpu.memory_space<vmem>>, vector<1x8x512xf32>
    %167 = vector.shape_cast %166 : vector<1x8x512xf32> to vector<8x512xf32>
    %cst_55 = arith.constant dense<0.000000e+00> : vector<8x512xf32>
    %168 = tpu.matmul %160, %12, %cst_55 {dimension_numbers = #tpu.dot_dimension_numbers<[1], [0], [0], [1], [0, 0, 1, 1], [], []>} : vector<8x128xf32>, vector<128x512xf32>, vector<8x512xf32> -> vector<8x512xf32>
    %169 = arith.addf %167, %168 : vector<8x512xf32>
    %170 = vector.extract_strided_slice %169 {offsets = [0, 0], sizes = [8, 384], strides = [1, 1]} : vector<8x512xf32> to vector<8x384xf32>
    %171 = arith.negf %170 : vector<8x384xf32>
    %172 = math.exp %171 : vector<8x384xf32>
    %cst_56 = arith.constant 1.000000e+00 : f32
    %173 = vector.broadcast %cst_56 : f32 to vector<8x384xf32>
    %174 = arith.addf %173, %172 : vector<8x384xf32>
    %175 = arith.divf %173, %174 : vector<8x384xf32>
    %176 = vector.extract_strided_slice %169 {offsets = [0, 384], sizes = [8, 128], strides = [1, 1]} : vector<8x512xf32> to vector<8x128xf32>
    %177 = math.tanh %176 : vector<8x128xf32>
    %178 = vector.extract_strided_slice %175 {offsets = [0, 0], sizes = [8, 128], strides = [1, 1]} : vector<8x384xf32> to vector<8x128xf32>
    %179 = vector.extract_strided_slice %175 {offsets = [0, 128], sizes = [8, 128], strides = [1, 1]} : vector<8x384xf32> to vector<8x128xf32>
    %180 = vector.extract_strided_slice %175 {offsets = [0, 256], sizes = [8, 128], strides = [1, 1]} : vector<8x384xf32> to vector<8x128xf32>
    %181 = arith.mulf %179, %158 : vector<8x128xf32>
    %182 = arith.mulf %178, %177 : vector<8x128xf32>
    %183 = arith.addf %181, %182 : vector<8x128xf32>
    %184 = math.tanh %183 : vector<8x128xf32>
    %185 = arith.mulf %180, %184 : vector<8x128xf32>
    %186 = arith.index_cast %c6_i32 : i32 to index
    %c0_57 = arith.constant 0 : index
    %c0_58 = arith.constant 0 : index
    %187 = vector.load %arg8[%186, %c0_57, %c0_58] : memref<8x8x128xf32, #tpu.memory_space<vmem>>, vector<1x8x128xf32>
    %188 = vector.shape_cast %187 : vector<1x8x128xf32> to vector<8x128xf32>
    %189 = vector.shape_cast %185 : vector<8x128xf32> to vector<1x8x128xf32>
    tpu.vector_store %arg8[%186, %c0_57, %c0_58], %189 {strides = array<i32>} : memref<8x8x128xf32, #tpu.memory_space<vmem>>, vector<1x8x128xf32>,
    %c7_i32 = arith.constant 7 : i32
    %190 = arith.index_cast %c7_i32 : i32 to index
    %c0_59 = arith.constant 0 : index
    %c0_60 = arith.constant 0 : index
    %191 = vector.load %arg11[%190, %c0_59, %c0_60] : memref<8x8x512xf32, #tpu.memory_space<vmem>>, vector<1x8x512xf32>
    %192 = vector.shape_cast %191 : vector<1x8x512xf32> to vector<8x512xf32>
    %cst_61 = arith.constant dense<0.000000e+00> : vector<8x512xf32>
    %193 = tpu.matmul %185, %12, %cst_61 {dimension_numbers = #tpu.dot_dimension_numbers<[1], [0], [0], [1], [0, 0, 1, 1], [], []>} : vector<8x128xf32>, vector<128x512xf32>, vector<8x512xf32> -> vector<8x512xf32>
    %194 = arith.addf %192, %193 : vector<8x512xf32>
    %195 = vector.extract_strided_slice %194 {offsets = [0, 0], sizes = [8, 384], strides = [1, 1]} : vector<8x512xf32> to vector<8x384xf32>
    %196 = arith.negf %195 : vector<8x384xf32>
    %197 = math.exp %196 : vector<8x384xf32>
    %cst_62 = arith.constant 1.000000e+00 : f32
    %198 = vector.broadcast %cst_62 : f32 to vector<8x384xf32>
    %199 = arith.addf %198, %197 : vector<8x384xf32>
    %200 = arith.divf %198, %199 : vector<8x384xf32>
    %201 = vector.extract_strided_slice %194 {offsets = [0, 384], sizes = [8, 128], strides = [1, 1]} : vector<8x512xf32> to vector<8x128xf32>
    %202 = math.tanh %201 : vector<8x128xf32>
    %203 = vector.extract_strided_slice %200 {offsets = [0, 0], sizes = [8, 128], strides = [1, 1]} : vector<8x384xf32> to vector<8x128xf32>
    %204 = vector.extract_strided_slice %200 {offsets = [0, 128], sizes = [8, 128], strides = [1, 1]} : vector<8x384xf32> to vector<8x128xf32>
    %205 = vector.extract_strided_slice %200 {offsets = [0, 256], sizes = [8, 128], strides = [1, 1]} : vector<8x384xf32> to vector<8x128xf32>
    %206 = arith.mulf %204, %183 : vector<8x128xf32>
    %207 = arith.mulf %203, %202 : vector<8x128xf32>
    %208 = arith.addf %206, %207 : vector<8x128xf32>
    %209 = math.tanh %208 : vector<8x128xf32>
    %210 = arith.mulf %205, %209 : vector<8x128xf32>
    %211 = arith.index_cast %c7_i32 : i32 to index
    %c0_63 = arith.constant 0 : index
    %c0_64 = arith.constant 0 : index
    %212 = vector.load %arg8[%211, %c0_63, %c0_64] : memref<8x8x128xf32, #tpu.memory_space<vmem>>, vector<1x8x128xf32>
    %213 = vector.shape_cast %212 : vector<1x8x128xf32> to vector<8x128xf32>
    %214 = vector.shape_cast %210 : vector<8x128xf32> to vector<1x8x128xf32>
    tpu.vector_store %arg8[%211, %c0_63, %c0_64], %214 {strides = array<i32>} : memref<8x8x128xf32, #tpu.memory_space<vmem>>, vector<1x8x128xf32>,
    %c8_i32 = arith.constant 8 : i32
    %c0_65 = arith.constant 0 : index
    %c0_66 = arith.constant 0 : index
    %215 = vector.load %arg9[%c0_65, %c0_66] : memref<8x128xf32, #tpu.memory_space<vmem>>, vector<8x128xf32>
    tpu.vector_store %arg9[%c0_65, %c0_66], %210 {strides = array<i32>} : memref<8x128xf32, #tpu.memory_space<vmem>>, vector<8x128xf32>,
    %c0_67 = arith.constant 0 : index
    %c0_68 = arith.constant 0 : index
    %216 = vector.load %arg10[%c0_67, %c0_68] : memref<8x128xf32, #tpu.memory_space<vmem>>, vector<8x128xf32>
    tpu.vector_store %arg10[%c0_67, %c0_68], %208 {strides = array<i32>} : memref<8x128xf32, #tpu.memory_space<vmem>>, vector<8x128xf32>,
    return
  }
  func.func @transform_0(%arg0: i32, %arg1: i32) -> (i32, i32, i32) {
    %c0_i32 = arith.constant 0 : i32
    %c0_i32_0 = arith.constant 0 : i32
    return %arg1, %arg0, %c0_i32 : i32, i32, i32
  }
  func.func @transform_1(%arg0: i32, %arg1: i32) -> (i32, i32) {
    %c0_i32 = arith.constant 0 : i32
    %c0_i32_0 = arith.constant 0 : i32
    return %arg0, %c0_i32 : i32, i32
  }
  func.func @transform_2(%arg0: i32, %arg1: i32) -> (i32, i32) {
    %c0_i32 = arith.constant 0 : i32
    %c0_i32_0 = arith.constant 0 : i32
    %c0_i32_1 = arith.constant 0 : i32
    return %c0_i32, %c0_i32_0 : i32, i32
  }
  func.func @transform_3(%arg0: i32, %arg1: i32) -> (i32, i32) {
    %c0_i32 = arith.constant 0 : i32
    %c0_i32_0 = arith.constant 0 : i32
    %c0_i32_1 = arith.constant 0 : i32
    return %c0_i32, %c0_i32_0 : i32, i32
  }
  func.func @transform_4(%arg0: i32, %arg1: i32) -> (i32, i32) {
    %c0_i32 = arith.constant 0 : i32
    %c0_i32_0 = arith.constant 0 : i32
    %c0_i32_1 = arith.constant 0 : i32
    return %c0_i32, %c0_i32_0 : i32, i32
  }
  func.func @transform_5(%arg0: i32, %arg1: i32) -> (i32, i32) {
    %c0_i32 = arith.constant 0 : i32
    %c0_i32_0 = arith.constant 0 : i32
    %c0_i32_1 = arith.constant 0 : i32
    return %c0_i32, %c0_i32_0 : i32, i32
  }
  func.func @transform_6(%arg0: i32, %arg1: i32) -> (i32, i32, i32) {
    %c0_i32 = arith.constant 0 : i32
    %c0_i32_0 = arith.constant 0 : i32
    return %arg1, %arg0, %c0_i32 : i32, i32, i32
  }
}

</mosaic_0001>

<bundles_post_ra>
// kernel: tpu_custom_call.1
= control target key start
LH: loop header
LB: loop body
LE: loop exit
PB: predicated region body
PF: predicated region fallthrough
CT: control target
= control target key end

     0   :  { %11 = vsyncpa [#allocation6], 0  ;;  %s3496_s0 = inlined_call_operand.hbm [shape: f32[8,8,8], index: 0, kind: input, shape index: {}]   ;;  %s3497_s1 = inlined_call_operand.hbm [shape: f32[8,48], index: 1, kind: input, shape index: {}]   ;;  %s3498_s2 = inlined_call_operand.hbm [shape: f32[48,256], index: 2, kind: input, shape index: {}]   ;;  %s3499_s3 = inlined_call_operand.hbm [shape: f32[8,512], index: 3, kind: input, shape index: {}]   ;;  %s3500_s4 = inlined_call_operand.vmem [shape: f32[1,512], index: 4, kind: input, shape index: {}]   ;;  %s3501_s5 = inlined_call_operand.hbm [shape: f32[128,512], index: 5, kind: input, shape index: {}]   ;;  %s3502_s6 = inlined_call_operand.hbm [shape: f32[8,8,128], index: 6, kind: output, shape index: {}]  }
   0x1   :  { %12 = vsyncpa [#allocation9], 0 }
   0x2   :  { %13 = vsyncpa [#allocation12], 0 }
   0x3   :  { %14 = vsyncpa [#allocation7], 0  ;;  %s2910_s21 = smov [#allocation8]   ;;  %s2911_s23 = smov [#allocation11]  }
   0x4   :  { %s33_s22 = sshll.u32 %s2910_s21, 4  ;;  %s55_s24 = sshll.u32 %s2911_s23, 4  ;;  %s34_s22 = int_to_ptr.vmem [resolvable:$true] %s33_s22  ;;  %s56_s24 = int_to_ptr.vmem [resolvable:$true] %s55_s24 }
   0x5   :  { %s2770_s27 = scalar_lea.hbm %s3497_s1, 128 }
   0x6   :  { %p2771_p0 = scmp.ne.s32.totalorder %s3497_s1, %s2770_s27  ;;  %p2774_p1 = scmp.lt.u32.totalorder %s2770_s27, %s3497_s1 }
   0x8   :  { %p2776_p2 = pnand %p2774_p1, %p2771_p0 }
   0xa   :  { %2779 = shalt.err (!%p2776_p2)
}
   0xb   :  { %s2780_s8 = scalar_lea.vmem %s34_s22, 128  ;;  %p2785_p4 = scmp.lt.s32.totalorder %s34_s22, %s34_s22 }
   0xc   :  { %p2781_p3 = scmp.ne.s32.totalorder %s34_s22, %s2780_s8  ;;  %p2786_p5 = scmp.lt.s32.totalorder %s2780_s8, %s2780_s8 }
   0xe   :  { %p2787_p6 = por %p2786_p5, %p2785_p4 }
  0x10   :  { %p2788_p7 = pnand %p2787_p6, %p2781_p3 }
  0x12   :  { %2791 = shalt.err (!%p2788_p7)
}
  0x13   :  { %36 = dma.hbm_to_vmem [thread:$0]  %s3497_s1, 128, %s34_s22, [#allocation9]  }
  0x14   :  { %s2792_s13 = scalar_lea.hbm %s3499_s3, 512 }
  0x15   :  { %p2793_p8 = scmp.ne.s32.totalorder %s3499_s3, %s2792_s13  ;;  %p2796_p9 = scmp.lt.u32.totalorder %s2792_s13, %s3499_s3 }
  0x17   :  { %p2798_p10 = pnand %p2796_p9, %p2793_p8 }
  0x19   :  { %2801 = shalt.err (!%p2798_p10)
}
  0x1a   :  { %s2802_s18 = scalar_lea.vmem %s56_s24, 512  ;;  %p2807_p12 = scmp.lt.s32.totalorder %s56_s24, %s56_s24 }
  0x1b   :  { %p2803_p11 = scmp.ne.s32.totalorder %s56_s24, %s2802_s18  ;;  %p2808_p13 = scmp.lt.s32.totalorder %s2802_s18, %s2802_s18 }
  0x1d   :  { %p2809_p0 = por %p2808_p13, %p2807_p12 }
  0x1f   :  { %p2810_p1 = pnand %p2809_p0, %p2803_p11 }
  0x21   :  { %2813 = shalt.err (!%p2810_p1)
}
  0x22   :  { %58 = dma.hbm_to_vmem [thread:$0]  %s3499_s3, 512, %s56_s24, [#allocation12]  }
  0x23   :  { %s2912_s20 = smov [#allocation5]   ;;  %s2814_s25 = scalar_lea.hbm %s3496_s0, 1024 }
  0x24   :  { %s20_s21 = sshll.u32 %s2912_s20, 4  ;;  %p2815_p2 = scmp.ne.s32.totalorder %s3496_s0, %s2814_s25  ;;  %s21_s21 = int_to_ptr.vmem [resolvable:$true] %s20_s21 }
  0x25   :  { %p2818_p3 = scmp.lt.u32.totalorder %s2814_s25, %s3496_s0 }
  0x27   :  { %p2820_p4 = pnand %p2818_p3, %p2815_p2 }
  0x29   :  { %2823 = shalt.err (!%p2820_p4)
}
  0x2a   :  { %s2824_s30 = scalar_lea.vmem %s21_s21, 1024  ;;  %p2829_p6 = scmp.lt.s32.totalorder %s21_s21, %s21_s21 }
  0x2b   :  { %p2825_p5 = scmp.ne.s32.totalorder %s21_s21, %s2824_s30  ;;  %p2830_p7 = scmp.lt.s32.totalorder %s2824_s30, %s2824_s30 }
  0x2d   :  { %p2831_p8 = por %p2830_p7, %p2829_p6 }
  0x2f   :  { %p2832_p9 = pnand %p2831_p8, %p2825_p5 }
  0x31   :  { %2835 = shalt.err (!%p2832_p9)
}
  0x32   :  { %s2913_s3 = smov 128   ;;  %s2914_s24 = smov 8  }
  0x33   :  { %26 = dma.hbm_to_vmem [thread:$0]  %s3496_s0, 1024, %s21_s21, [#allocation6], %s2913_s3, %s2913_s3, %s2914_s24  }
  0x34   :  { %s2915_s9 = smov [#allocation10]   ;;  %s2836_s13 = scalar_lea.hbm %s3498_s2, 1536 }
  0x35   :  { %s42_s10 = sshll.u32 %s2915_s9, 4  ;;  %p2837_p10 = scmp.ne.s32.totalorder %s3498_s2, %s2836_s13  ;;  %s43_s10 = int_to_ptr.vmem [resolvable:$true] %s42_s10 }
  0x36   :  { %p2840_p11 = scmp.lt.u32.totalorder %s2836_s13, %s3498_s2 }
  0x38   :  { %p2842_p12 = pnand %p2840_p11, %p2837_p10 }
  0x3a   :  { %2845 = shalt.err (!%p2842_p12)
}
  0x3b   :  { %s2846_s18 = scalar_lea.vmem %s43_s10, 1536  ;;  %p2851_p0 = scmp.lt.s32.totalorder %s43_s10, %s43_s10 }
  0x3c   :  { %p2847_p13 = scmp.ne.s32.totalorder %s43_s10, %s2846_s18  ;;  %p2852_p1 = scmp.lt.s32.totalorder %s2846_s18, %s2846_s18 }
  0x3e   :  { %p2853_p2 = por %p2852_p1, %p2851_p0 }
  0x40   :  { %p2854_p3 = pnand %p2853_p2, %p2847_p13 }
  0x42   :  { %2857 = shalt.err (!%p2854_p3)
}
  0x43   :  { %s2916_s0 = smov 256   ;;  %s2917_s1 = smov 16  }
  0x44   :  { %48 = dma.hbm_to_vmem [thread:$0]  %s3498_s2, 1536, %s43_s10, [#allocation9], %s2916_s0, %s2916_s0, %s2917_s1  }
  0x45   :  { %s2918_s21 = smov [#allocation13]   ;;  %s2858_s26 = scalar_lea.hbm %s3501_s5, 8192 }
  0x46   :  { %s66_s22 = sshll.u32 %s2918_s21, 4  ;;  %p2859_p4 = scmp.ne.s32.totalorder %s3501_s5, %s2858_s26  ;;  %s67_s22 = int_to_ptr.vmem [resolvable:$true] %s66_s22 }
  0x47   :  { %p2862_p5 = scmp.lt.u32.totalorder %s2858_s26, %s3501_s5 }
  0x49   :  { %p2864_p6 = pnand %p2862_p5, %p2859_p4 }
  0x4b   :  { %2867 = shalt.err (!%p2864_p6)
}
  0x4c   :  { %s2868_s7 = scalar_lea.vmem %s67_s22, 8192  ;;  %p2873_p8 = scmp.lt.s32.totalorder %s67_s22, %s67_s22 }
  0x4d   :  { %p2869_p7 = scmp.ne.s32.totalorder %s67_s22, %s2868_s7  ;;  %p2874_p9 = scmp.lt.s32.totalorder %s2868_s7, %s2868_s7 }
  0x4f   :  { %p2875_p10 = por %p2874_p9, %p2873_p8 }
  0x51   :  { %p2876_p11 = pnand %p2875_p10, %p2869_p7 }
  0x53   :  { %2879 = shalt.err (!%p2876_p11)
}
  0x54   :  { %s2919_s2 = smov 512   ;;  %s2920_s8 = smov 32  }
  0x55   :  { %72 = dma.hbm_to_vmem [thread:$0]  %s3501_s5, 8192, %s67_s22, [#allocation12], %s2919_s2, %s2919_s2, %s2920_s8  }
  0x56   :  { %2902 = dma.done.wait [#allocation6], 1024  }
  0x57   :  { %2903 = vsyncadd [#allocation6], 4294966272 }
  0x58   :  { %2904 = dma.done.wait [#allocation9], 1664  }
  0x59   :  { %2905 = vsyncadd [#allocation9], 4294965632 }
  0x5a   :  { %2906 = dma.done.wait [#allocation12], 8704  }
  0x5b   :  { %2907 = vsyncadd [#allocation12], 4294958592  ;;  %v2921_v0 = vmov 0.0   ;;  %v94_v1 = vld [vmem:[#allocation10 + $0x8] sm:$0xff]  ;;  %v96_v2 = vld [vmem:[#allocation10 + $0x18] sm:$0xff]  ;;  %vm216_vm0 = vcmask 64512  }
  0x5c   :  { %173 = vmatprep.mubr.f32.mxu0 %v2921_v0  ;;  %305 = vmatprep.mubr.f32.mxu1 %v2921_v0  ;;  %v93_v3 = vld [vmem:[#allocation10] sm:$0xff]  ;;  %v2041_v4 = vpack.c.bf16 %v96_v2, %v94_v1  ;;  %v95_v5 = vld [vmem:[#allocation10 + $0x10] sm:$0xff]  ;;  %v98_v6 = vld [vmem:[#allocation10 + $0x28] sm:$0xff]  ;;  %vm105_vm1 = vcmask 392192  }
  0x5d   :  { %v100_v7 = vld [vmem:[#allocation10 + $0x38] sm:$0xff]  ;;  %v2043_v8 = vpack.c.bf16 %v95_v5, %v93_v3  ;;  %v97_v10 = vld [vmem:[#allocation10 + $0x20] sm:$0xff]  ;;  %v99_v11 = vld [vmem:[#allocation10 + $0x30] sm:$0xff] }
  0x5e   :  { %v2045_v9 = vpack.c.bf16 %v100_v7, %v98_v6  ;;  %v102_v12 = vld [vmem:[#allocation10 + $0x48] sm:$0xff]  ;;  %2042 = vmatprep.subr.bf16.mxu0 %v2041_v4  ;;  %v104_v13 = vld [vmem:[#allocation10 + $0x58] sm:$0xff]  ;;  %v2047_v14 = vpack.c.bf16 %v99_v11, %v97_v10  ;;  %v190_v16 = vld [vmem:[#allocation11] sm:$0xff] }
  0x5f   :  { %2044 = vmatpush1.bf16.msra.mxu0 %v2043_v8  ;;  %v191_v15 = vld [vmem:[#allocation11 + $0x8] sm:$0xff]  ;;  %v2049_v17 = vpack.c.bf16 %v104_v13, %v102_v12  ;;  %v101_v18 = vld [vmem:[#allocation10 + $0x40] sm:$0xff]  ;;  %v103_v19 = vld [vmem:[#allocation10 + $0x50] sm:$0xff] }
  0x60   :  { %2046 = vmatprep.subr.bf16.mxu0 %v2045_v9  ;;  %241 = vmatprep.subr.mxu1 %v191_v15  ;;  %v500_v20 = vld [vmem:[#allocation13 + $0x8] sm:$0xff]  ;;  %v3023_v22 = vld [vmem:[#allocation5] sm:$0xff]  ;;  %v499_v23 = vld [vmem:[#allocation13] sm:$0xff]  ;;  %v2051_v26 = vpack.c.bf16 %v103_v19, %v101_v18 }
  0x61   :  { %242 = vmatpush1.msra.mxu1 %v190_v16  ;;  %v504_v21 = vld [vmem:[#allocation13 + $0x28] sm:$0xff]  ;;  %v503_v25 = vld [vmem:[#allocation13 + $0x20] sm:$0xff]  ;;  %v193_v27 = vld [vmem:[#allocation11 + $0x18] sm:$0xff] }
  0x62   :  { %v3025_v24 = vpack.c.bf16 %v504_v21, %v500_v20  ;;  %2001 = vmatmul.mubr.msk.f32.vlgmr.msra.gmra.mrb[0].mxu1 %vm216_vm0, %v3023_v22  ;;  %v3029_v28 = vpack.c.bf16 %v503_v25, %v499_v23  ;;  %v508_v29 = vld [vmem:[#allocation13 + $0x48] sm:$0xff]  ;;  %v3033_v31 = vld [vmem:[#allocation5 + $0x8] sm:$0xff]  ;;  %v502_v33 = vld [vmem:[#allocation13 + $0x18] sm:$0xff] }
  0x63   :  { %2048 = vmatpush1.bf16.msra.mxu0 %v2047_v14  ;;  %311 = vmatprep.mubr.f32.mxu1 %v2921_v0  ;;  %v512_v30 = vld [vmem:[#allocation13 + $0x68] sm:$0xff]  ;;  %v507_v32 = vld [vmem:[#allocation13 + $0x40] sm:$0xff]  ;;  %v506_v34 = vld [vmem:[#allocation13 + $0x38] sm:$0xff] }
  0x64   :  { %2050 = vmatprep.subr.bf16.mxu0 %v2049_v17  ;;  %2054 = vmatprep.subr.bf16.mxu1 %v3025_v24  ;;  %v3036_v35 = vpack.c.bf16 %v512_v30, %v508_v29  ;;  %v511_v36 = vld [vmem:[#allocation13 + $0x60] sm:$0xff]  ;;  %v92_v37 = vld [vmem:[#allocation8] sm:$0xff]  ;;  %v192_v38 = vld [vmem:[#allocation11 + $0x10] sm:$0xff]  ;;  %v3043_v44 = vpack.c.bf16 %v506_v34, %v502_v33 }
  0x65   :  { %2056 = vmatpush1.bf16.msra.mxu1 %v3029_v28  ;;  %v3040_v39 = vpack.c.bf16 %v511_v36, %v507_v32  ;;  %v516_v40 = vld [vmem:[#allocation13 + $0x88] sm:$0xff]  ;;  %v501_v41 = vld [vmem:[#allocation13 + $0x10] sm:$0xff]  ;;  %v515_v43 = vld [vmem:[#allocation13 + $0x80] sm:$0xff] }
  0x66   :  { %2002 = vmatmul.mubr.msk.f32.gmra.mrb[2].mxu1 %vm216_vm0, %v3033_v31  ;;  %2058 = vmatprep.subr.bf16.mxu1 %v3036_v35  ;;  %v520_v42 = vld [vmem:[#allocation13 + $0xa8] sm:$0xff]  ;;  %v505_v45 = vld [vmem:[#allocation13 + $0x30] sm:$0xff]  ;;  %v510_v46 = vld [vmem:[#allocation13 + $0x58] sm:$0xff] }
  0x67   :  { %2052 = vmatpush1.bf16.msra.mxu0 %v2051_v26  ;;  %317 = vmatprep.mubr.f32.mxu1 %v2921_v0  ;;  %v3046_v47 = vpack.c.bf16 %v520_v42, %v516_v40  ;;  %v519_v48 = vld [vmem:[#allocation13 + $0xa0] sm:$0xff]  ;;  %v514_v49 = vld [vmem:[#allocation13 + $0x78] sm:$0xff]  ;;  %v3049_v50 = vld [vmem:[#allocation5 + $0x10] sm:$0xff]  ;;  %v3056_v55 = vpack.c.bf16 %v505_v45, %v501_v41 }
  0x68   :  { %354 = vmatprep.subr.mxu0 %v193_v27  ;;  %v3051_v51 = vpack.c.bf16 %v519_v48, %v515_v43  ;;  %v524_v52 = vld [vmem:[#allocation13 + $0xc8] sm:$0xff]  ;;  %v523_v54 = vld [vmem:[#allocation13 + $0xc0] sm:$0xff]  ;;  %v509_v56 = vld [vmem:[#allocation13 + $0x50] sm:$0xff]  ;;  %v3061_v59 = vpack.c.bf16 %v514_v49, %v510_v46 }
  0x69   :  { %2060 = vmatpush1.bf16.msra.mxu1 %v3040_v39  ;;  %v528_v53 = vld [vmem:[#allocation13 + $0xe8] sm:$0xff]  ;;  %v527_v58 = vld [vmem:[#allocation13 + $0xe0] sm:$0xff]  ;;  %v513_v60 = vld [vmem:[#allocation13 + $0x70] sm:$0xff] }
  0x6a   :  { %2000 = vmatmul.mubr.msk.f32.vlgmr.msra.gmra.mrb[0].mxu0 %vm105_vm1, %v92_v37  ;;  %2062 = vmatprep.subr.bf16.mxu1 %v3046_v47  ;;  %v3058_v57 = vpack.c.bf16 %v528_v53, %v524_v52  ;;  %v518_v61 = vld [vmem:[#allocation13 + $0x98] sm:$0xff]  ;;  %v532_v62 = vld [vmem:[#allocation13 + $0x108] sm:$0xff]  ;;  %v3067_v1 = vld [vmem:[#allocation5 + $0x18] sm:$0xff]  ;;  %v3069_v2 = vpack.c.bf16 %v527_v58, %v523_v54  ;;  %v3078_v7 = vpack.c.bf16 %v513_v60, %v509_v56 }
  0x6b   :  { %355 = vmatpush1.msra.mxu0 %v192_v38  ;;  %418 = vmatprep.mubr.f32.mxu0 %v2921_v0  ;;  %v522_v63 = vld [vmem:[#allocation13 + $0xb8] sm:$0xff]  ;;  %v536_v3 = vld [vmem:[#allocation13 + $0x128] sm:$0xff]  ;;  %v531_v5 = vld [vmem:[#allocation13 + $0x100] sm:$0xff] }
  0x6c   :  { %2086 = vmatprep.subr.bf16.mxu0 %v3043_v44  ;;  %2003 = vmatmul.mubr.msk.f32.gmra.mrb[4].mxu1 %vm216_vm0, %v3049_v50  ;;  %v3074_v4 = vpack.c.bf16 %v536_v3, %v532_v62  ;;  %v535_v6 = vld [vmem:[#allocation13 + $0x120] sm:$0xff]  ;;  %v540_v8 = vld [vmem:[#allocation13 + $0x148] sm:$0xff]  ;;  %v3081_v9 = vpack.c.bf16 %v522_v63, %v518_v61  ;;  %v517_v10 = vld [vmem:[#allocation13 + $0x90] sm:$0xff] }
  0x6d   :  { %2064 = vmatpush1.bf16.msra.mxu1 %v3051_v51  ;;  %323 = vmatprep.mubr.f32.mxu1 %v2921_v0  ;;  %v521_v11 = vld [vmem:[#allocation13 + $0xb0] sm:$0xff]  ;;  %v544_v12 = vld [vmem:[#allocation13 + $0x168] sm:$0xff]  ;;  %v526_v13 = vld [vmem:[#allocation13 + $0xd8] sm:$0xff]  ;;  %v3089_v16 = vpack.c.bf16 %v535_v6, %v531_v5 }
  0x6e   :  { %2009 = vmatmul.mubr.msk.f32.vlgmr.msra.gmra.mrb[2].mxu0 %vm216_vm0, %v3023_v22  ;;  %2066 = vmatprep.subr.bf16.mxu1 %v3058_v57  ;;  %v530_v14 = vld [vmem:[#allocation13 + $0xf8] sm:$0xff]  ;;  %v3094_v17 = vpack.c.bf16 %v544_v12, %v540_v8  ;;  %v539_v18 = vld [vmem:[#allocation13 + $0x140] sm:$0xff]  ;;  %v3098_v20 = vpack.c.bf16 %v521_v11, %v517_v10  ;;  %v548_v21 = vld [vmem:[#allocation13 + $0x188] sm:$0xff] }
  0x6f   :  { %2088 = vmatpush1.bf16.msra.mxu0 %v3056_v55  ;;  %424 = vmatprep.mubr.f32.mxu0 %v2921_v0  ;;  %v3087_v15 = vld [vmem:[#allocation5 + $0x20] sm:$0xff]  ;;  %v543_v19 = vld [vmem:[#allocation13 + $0x160] sm:$0xff]  ;;  %v552_v22 = vld [vmem:[#allocation13 + $0x1a8] sm:$0xff]  ;;  %v3101_v23 = vpack.c.bf16 %v530_v14, %v526_v13 }
  0x70   :  { %2090 = vmatprep.subr.bf16.mxu0 %v3061_v59  ;;  %2004 = vmatmul.mubr.msk.f32.gmra.mrb[6].mxu1 %vm216_vm0, %v3067_v1  ;;  %v525_v25 = vld [vmem:[#allocation13 + $0xd0] sm:$0xff]  ;;  %v534_v27 = vld [vmem:[#allocation13 + $0x118] sm:$0xff]  ;;  %v187_v30 = vld [vmem:[#allocation5 + $0x28] sm:$0xff]  ;;  %v3112_v32 = vpack.c.bf16 %v552_v22, %v548_v21  ;;  %v196_v21 = vlaneseq }
  0x71   :  { %2068 = vmatpush1.bf16.msra.mxu1 %v3069_v2  ;;  %329 = vmatprep.mubr.f32.mxu1 %v2921_v0  ;;  %v529_v26 = vld [vmem:[#allocation13 + $0xf0] sm:$0xff]  ;;  %v538_v29 = vld [vmem:[#allocation13 + $0x138] sm:$0xff]  ;;  %v547_v33 = vld [vmem:[#allocation13 + $0x180] sm:$0xff] }
  0x72   :  { %2010 = vmatmul.mubr.msk.f32.gmra.mrb[4].mxu0 %vm216_vm0, %v3033_v31  ;;  %2070 = vmatprep.subr.bf16.mxu1 %v3074_v4  ;;  %v3107_v31 = vpack.c.bf16 %v543_v19, %v539_v18  ;;  %v551_v34 = vld [vmem:[#allocation13 + $0x1a0] sm:$0xff]  ;;  %v3116_v36 = vpack.c.bf16 %v529_v26, %v525_v25  ;;  %v556_v37 = vld [vmem:[#allocation13 + $0x1c8] sm:$0xff]  ;;  %v3119_v40 = vpack.c.bf16 %v538_v29, %v534_v27  ;;  %v533_v41 = vld [vmem:[#allocation13 + $0x110] sm:$0xff]  ;;  %v197_v22 = vshrl.u32 %v196_v21, 7 }
  0x73   :  { %2092 = vmatpush1.bf16.msra.mxu0 %v3078_v7  ;;  %430 = vmatprep.mubr.f32.mxu0 %v2921_v0  ;;  %v560_v38 = vld [vmem:[#allocation13 + $0x1e8] sm:$0xff]  ;;  %v537_v42 = vld [vmem:[#allocation13 + $0x130] sm:$0xff]  ;;  %v542_v43 = vld [vmem:[#allocation13 + $0x158] sm:$0xff]  ;;  %v3124_v48 = vpack.c.bf16 %v551_v34, %v547_v33 }
  0x74   :  { %2094 = vmatprep.subr.bf16.mxu0 %v3081_v9  ;;  %2005 = vmatmul.mubr.msk.f32.gmra.mrb[8].mxu1 %vm216_vm0, %v3087_v15  ;;  %v546_v45 = vld [vmem:[#allocation13 + $0x178] sm:$0xff]  ;;  %v188_v46 = vld [vmem:[#allocation5 + $0x30] sm:$0xff]  ;;  %v3129_v49 = vpack.c.bf16 %v560_v38, %v556_v37  ;;  %v559_v52 = vld [vmem:[#allocation13 + $0x1e0] sm:$0xff]  ;;  %v3133_v53 = vpack.c.bf16 %v537_v42, %v533_v41  ;;  %v198_v25 = vsub.s32 0, %v197_v22  ;;  %v202_v27 = vsub.s32 1, %v197_v22 }
  0x75   :  { %2072 = vmatpush1.bf16.msra.mxu1 %v3089_v16  ;;  %335 = vmatprep.mubr.f32.mxu1 %v2921_v0  ;;  %v3136_v54 = vpack.c.bf16 %v546_v45, %v542_v43  ;;  %v541_v56 = vld [vmem:[#allocation13 + $0x150] sm:$0xff]  ;;  %v550_v60 = vld [vmem:[#allocation13 + $0x198] sm:$0xff]  ;;  %v206_v38 = vsub.s32 2, %v197_v22 }
  0x76   :  { %2011 = vmatmul.mubr.msk.f32.gmra.mrb[6].mxu0 %vm216_vm0, %v3049_v50  ;;  %2074 = vmatprep.subr.bf16.mxu1 %v3094_v17  ;;  %v555_v50 = vld [vmem:[#allocation13 + $0x1c0] sm:$0xff]  ;;  %v545_v58 = vld [vmem:[#allocation13 + $0x170] sm:$0xff]  ;;  %v554_v61 = vld [vmem:[#allocation13 + $0x1b8] sm:$0xff] }
  0x77   :  { %2096 = vmatpush1.bf16.msra.mxu0 %v3098_v20  ;;  %436 = vmatprep.mubr.f32.mxu0 %v2921_v0  ;;  %v189_v62 = vld [vmem:[#allocation5 + $0x38] sm:$0xff]  ;;  %v3141_v63 = vpack.c.bf16 %v559_v52, %v555_v50  ;;  %v3151_v3 = vpack.c.bf16 %v554_v61, %v550_v60  ;;  %v558_v8 = vld [vmem:[#allocation13 + $0x1d8] sm:$0xff]  ;;  %v210_v50 = vsub.s32 3, %v197_v22 }
  0x78   :  { %2098 = vmatprep.subr.bf16.mxu0 %v3101_v23  ;;  %2006 = vmatmul.mubr.msk.f32.gmra.mrb[10].mxu1 %vm216_vm0, %v187_v30  ;;  %v549_v5 = vld [vmem:[#allocation13 + $0x190] sm:$0xff]  ;;  %v562_v10 = vld [vmem:[#allocation13 + $0x1f8] sm:$0xff] }
  0x79   :  { %2076 = vmatpush1.bf16.msra.mxu1 %v3107_v31  ;;  %341 = vmatprep.mubr.f32.mxu1 %v2921_v0  ;;  %v553_v6 = vld [vmem:[#allocation13 + $0x1b0] sm:$0xff]  ;;  %v3163_v12 = vpack.c.bf16 %v562_v10, %v558_v8  ;;  %v194_v26 = vld [vmem:[%s3500_s4] sm:$0xf]  ;;  %s2922_s4 = smov [#allocation14]  }
  0x7a   :  { %2012 = vmatmul.mubr.msk.f32.gmra.mrb[8].mxu0 %vm216_vm0, %v3067_v1  ;;  %2078 = vmatprep.subr.bf16.mxu1 %v3112_v32  ;;  %v3148_v1 = vpack.c.bf16 %v545_v58, %v541_v56  ;;  %v3160_v11 = vpack.c.bf16 %v553_v6, %v549_v5  ;;  %v557_v13 = vld [vmem:[#allocation13 + $0x1d0] sm:$0xff]  ;;  %v3214_v29 = vrot.slane %v194_v26, %v198_v25  ;;  %s1986_s12 = sshll.u32 %s2922_s4, 4  ;;  %s1987_s12 = int_to_ptr.vmem [resolvable:$true] %s1986_s12 }
  0x7b   :  { %2100 = vmatpush1.bf16.msra.mxu0 %v3116_v36  ;;  %442 = vmatprep.mubr.f32.mxu0 %v2921_v0  ;;  %v561_v14 = vld [vmem:[#allocation13 + $0x1f0] sm:$0xff]  ;;  %v3220_v52 = vrot.slane %v194_v26, %v206_v38  ;;  %v3222_v56 = vrot.slane %v194_v26, %v210_v50  ;;  %s2880_s13 = scalar_lea.vmem %s1987_s12, 1024  ;;  %p2885_p13 = scmp.lt.s32.totalorder %s1987_s12, %s1987_s12 }
  0x7c   :  { %2102 = vmatprep.subr.bf16.mxu0 %v3119_v40  ;;  %2007 = vmatmul.mubr.msk.f32.gmra.mrb[12].mxu1 %vm216_vm0, %v188_v46  ;;  %p2881_p12 = scmp.ne.s32.totalorder %s1987_s12, %s2880_s13  ;;  %p2886_p0 = scmp.lt.s32.totalorder %s2880_s13, %s2880_s13 }
  0x7d   :  { %2080 = vmatpush1.bf16.msra.mxu1 %v3124_v48  ;;  %347 = vmatprep.mubr.f32.mxu1 %v2921_v0 }
  0x7e   :  { %2013 = vmatmul.mubr.msk.f32.gmra.mrb[10].mxu0 %vm216_vm0, %v3087_v15  ;;  %2082 = vmatprep.subr.bf16.mxu1 %v3129_v49  ;;  %v3168_v15 = vpack.c.bf16 %v561_v14, %v557_v13  ;;  %p2887_p1 = por %p2886_p0, %p2885_p13 }
  0x7f   :  { %2104 = vmatpush1.bf16.msra.mxu0 %v3133_v53  ;;  %448 = vmatprep.mubr.f32.mxu0 %v2921_v0 }
  0x80   :  { %2106 = vmatprep.subr.bf16.mxu0 %v3136_v54  ;;  %2008 = vmatmul.mubr.msk.f32.gmra.mrb[14].mxu1 %vm216_vm0, %v189_v62  ;;  %p2888_p2 = pnand %p2887_p1, %p2881_p12 }
  0x81   :  { %2084 = vmatpush1.bf16.msra.mxu1 %v3141_v63  ;;  %633 = vmatprep.mubr.f32.mxu1 %v2921_v0 }
  0x82   :  { %2014 = vmatmul.mubr.msk.f32.gmra.mrb[12].mxu0 %vm216_vm0, %v187_v30  ;;  %2118 = vmatprep.subr.bf16.mxu1 %v3025_v24  ;;  %v3216_v30 = vrot.slane %v194_v26, %v202_v27 }
  0x83   :  { %2108 = vmatpush1.bf16.msra.mxu0 %v3148_v1  ;;  %454 = vmatprep.mubr.f32.mxu0 %v2921_v0 }
  0x84   :  { %2110 = vmatprep.subr.bf16.mxu0 %v3151_v3 }
  0x86   :  { %2015 = vmatmul.mubr.msk.f32.gmra.mrb[14].mxu0 %vm216_vm0, %v188_v46 }
  0x87   :  { %2112 = vmatpush1.bf16.msra.mxu0 %v3160_v11  ;;  %460 = vmatprep.mubr.f32.mxu0 %v2921_v0 }
  0x88   :  { %2114 = vmatprep.subr.bf16.mxu0 %v3163_v12 }
  0x8a   :  { %2016 = vmatmul.mubr.msk.f32.gmra.mrb[16].mxu0 %vm216_vm0, %v189_v62 }
  0x8b   :  { %2116 = vmatpush1.bf16.msra.mxu0 %v3168_v15  ;;  %704 = vmatprep.mubr.f32.mxu0 %v2921_v0 }
  0x8c   :  { %2150 = vmatprep.subr.bf16.mxu0 %v3043_v44 }
 0x13d   :  { %v175_v18 = vpop.f32.mrb[0].mxu0 }
 0x13e   :  { %v3175_v19 = vpop.f32.mrb[1].mxu0  ;;  %634 = vmatmul.mubr.f32.vlgmr.msra.gmra.mrb[0].mxu1 %v175_v18  ;;  %705 = vmatmul.mubr.f32.vlgmr.msra.gmra.mrb[2].mxu0 %v175_v18 }
 0x13f   :  { %2120 = vmatpush1.bf16.msra.mxu1 %v3029_v28  ;;  %2152 = vmatpush1.bf16.msra.mxu0 %v3056_v55 }
 0x140   :  { %2122 = vmatprep.subr.bf16.mxu1 %v3036_v35  ;;  %2154 = vmatprep.subr.bf16.mxu0 %v3061_v59 }
 0x141   :  { %809 = vmatprep.mubr.f32.mxu1 %v2921_v0  ;;  %880 = vmatprep.mubr.f32.mxu0 %v2921_v0 }
 0x143   :  { %2124 = vmatpush1.bf16.msra.mxu1 %v3040_v39  ;;  %2156 = vmatpush1.bf16.msra.mxu0 %v3078_v7 }
 0x144   :  { %2126 = vmatprep.subr.bf16.mxu1 %v3046_v47  ;;  %2158 = vmatprep.subr.bf16.mxu0 %v3081_v9 }
 0x147   :  { %2128 = vmatpush1.bf16.msra.mxu1 %v3051_v51  ;;  %2160 = vmatpush1.bf16.msra.mxu0 %v3098_v20 }
 0x148   :  { %2130 = vmatprep.subr.bf16.mxu1 %v3058_v57  ;;  %2162 = vmatprep.subr.bf16.mxu0 %v3101_v23 }
 0x14b   :  { %2132 = vmatpush1.bf16.msra.mxu1 %v3069_v2  ;;  %2164 = vmatpush1.bf16.msra.mxu0 %v3116_v36 }
 0x14c   :  { %2134 = vmatprep.subr.bf16.mxu1 %v3074_v4  ;;  %2166 = vmatprep.subr.bf16.mxu0 %v3119_v40 }
 0x14f   :  { %2136 = vmatpush1.bf16.msra.mxu1 %v3089_v16  ;;  %2168 = vmatpush1.bf16.msra.mxu0 %v3133_v53 }
 0x150   :  { %2138 = vmatprep.subr.bf16.mxu1 %v3094_v17  ;;  %2170 = vmatprep.subr.bf16.mxu0 %v3136_v54 }
 0x153   :  { %2140 = vmatpush1.bf16.msra.mxu1 %v3107_v31  ;;  %2172 = vmatpush1.bf16.msra.mxu0 %v3148_v1 }
 0x154   :  { %2142 = vmatprep.subr.bf16.mxu1 %v3112_v32  ;;  %2174 = vmatprep.subr.bf16.mxu0 %v3151_v3 }
 0x157   :  { %2144 = vmatpush1.bf16.msra.mxu1 %v3124_v48  ;;  %2176 = vmatpush1.bf16.msra.mxu0 %v3160_v11 }
 0x158   :  { %2146 = vmatprep.subr.bf16.mxu1 %v3129_v49  ;;  %2178 = vmatprep.subr.bf16.mxu0 %v3163_v12 }
 0x15b   :  { %2148 = vmatpush1.bf16.msra.mxu1 %v3141_v63  ;;  %2180 = vmatpush1.bf16.msra.mxu0 %v3168_v15 }
 0x15c   :  { %2182 = vmatprep.subr.bf16.mxu1 %v3025_v24  ;;  %2214 = vmatprep.subr.bf16.mxu0 %v3043_v44 }
 0x211   :  { %v635_v33 = vpop.f32.mrb[0].mxu1  ;;  %v706_v34 = vpop.f32.mrb[2].mxu0 }
 0x212   :  { %v2565_v37 = vadd.f32 %v635_v33, %v3214_v29  ;;  %v637_v41 = vpop.f32.mrb[1].mxu1  ;;  %v708_v42 = vpop.f32.mrb[3].mxu0  ;;  %v2581_v58 = vadd.f32 %v706_v34, %v3220_v52 }
 0x213   :  { %v2566_v43 = vadd.f32 %v637_v41, %v3216_v30  ;;  %v2582_v60 = vadd.f32 %v708_v42, %v3222_v56 }
 0x214   :  { %v2017_v45 = vmul.f32 -1.442695, %v2565_v37  ;;  %v2019_v61 = vmul.f32 -1.442695, %v2581_v58 }
 0x215   :  { %v2018_v46 = vmul.f32 -1.442695, %v2566_v43 }
 0x216   :  { %2642 = vpow2.f32 %v2017_v45 }
 0x217   :  { %2644 = vpow2.f32 %v2018_v46 }
 0x218   :  { %2646 = vtanh.f32 %v2582_v60 }
 0x219   :  { %2648 = vpow2.f32 %v2019_v61 }
 0x220   :  { %v2643_v62 = vpop.eup %2642 }
 0x221   :  { %v724_v5 = vadd.f32 1.0, %v2643_v62  ;;  %v2645_v6 = vpop.eup %2644 }
 0x222   :  { %v725_v8 = vadd.f32 1.0, %v2645_v6  ;;  %v2647_v10 = vpop.eup %2646 }
 0x223   :  { %2650 = vrcp.f32 %v724_v5  ;;  %v2649_v13 = vpop.eup %2648 }
 0x224   :  { %2652 = vrcp.f32 %v725_v8  ;;  %v726_v22 = vadd.f32 1.0, %v2649_v13 }
 0x226   :  { %2654 = vrcp.f32 %v726_v22 }
 0x22d   :  { %v2651_v14 = vpop.eup %2650 }
 0x22e   :  { %v735_v18 = vmul.f32 %v2651_v14, %v2647_v10  ;;  %v2653_v21 = vpop.eup %2652 }
 0x22f   :  { %v734_v25 = vmul.f32 %v2653_v21, %v3175_v19 }
 0x230   :  { %v2655_v27 = vpop.eup %2654 }
 0x231   :  { %v3227_v26 = vadd.f32 %v735_v18, %v734_v25 }
 0x233   :  { %2656 = vtanh.f32 %v3227_v26 }
 0x23d   :  { %v2657_v33 = vpop.eup %2656 }
 0x23e   :  { %v738_v34 = vmul.f32 %v2657_v33, %v2655_v27 }
 0x240   :  { %739 = vst [vmem:[#allocation14] sm:$0xff] %v738_v34  ;;  %810 = vmatmul.mubr.f32.vlgmr.msra.gmra.mrb[2].mxu1 %v738_v34  ;;  %881 = vmatmul.mubr.f32.vlgmr.msra.gmra.mrb[4].mxu0 %v738_v34 }
 0x241   :  { %2184 = vmatpush1.bf16.msra.mxu1 %v3029_v28  ;;  %2216 = vmatpush1.bf16.msra.mxu0 %v3056_v55 }
 0x242   :  { %2186 = vmatprep.subr.bf16.mxu1 %v3036_v35  ;;  %2218 = vmatprep.subr.bf16.mxu0 %v3061_v59 }
 0x243   :  { %986 = vmatprep.mubr.f32.mxu1 %v2921_v0  ;;  %1057 = vmatprep.mubr.f32.mxu0 %v2921_v0 }
 0x245   :  { %2188 = vmatpush1.bf16.msra.mxu1 %v3040_v39  ;;  %2220 = vmatpush1.bf16.msra.mxu0 %v3078_v7 }
 0x246   :  { %2190 = vmatprep.subr.bf16.mxu1 %v3046_v47  ;;  %2222 = vmatprep.subr.bf16.mxu0 %v3081_v9 }
 0x249   :  { %2192 = vmatpush1.bf16.msra.mxu1 %v3051_v51  ;;  %2224 = vmatpush1.bf16.msra.mxu0 %v3098_v20 }
 0x24a   :  { %2194 = vmatprep.subr.bf16.mxu1 %v3058_v57  ;;  %2226 = vmatprep.subr.bf16.mxu0 %v3101_v23 }
 0x24d   :  { %2196 = vmatpush1.bf16.msra.mxu1 %v3069_v2  ;;  %2228 = vmatpush1.bf16.msra.mxu0 %v3116_v36 }
 0x24e   :  { %2198 = vmatprep.subr.bf16.mxu1 %v3074_v4  ;;  %2230 = vmatprep.subr.bf16.mxu0 %v3119_v40 }
 0x251   :  { %2200 = vmatpush1.bf16.msra.mxu1 %v3089_v16  ;;  %2232 = vmatpush1.bf16.msra.mxu0 %v3133_v53 }
 0x252   :  { %2202 = vmatprep.subr.bf16.mxu1 %v3094_v17  ;;  %2234 = vmatprep.subr.bf16.mxu0 %v3136_v54 }
 0x255   :  { %2204 = vmatpush1.bf16.msra.mxu1 %v3107_v31  ;;  %2236 = vmatpush1.bf16.msra.mxu0 %v3148_v1 }
 0x256   :  { %2206 = vmatprep.subr.bf16.mxu1 %v3112_v32  ;;  %2238 = vmatprep.subr.bf16.mxu0 %v3151_v3 }
 0x259   :  { %2208 = vmatpush1.bf16.msra.mxu1 %v3124_v48  ;;  %2240 = vmatpush1.bf16.msra.mxu0 %v3160_v11 }
 0x25a   :  { %2210 = vmatprep.subr.bf16.mxu1 %v3129_v49  ;;  %2242 = vmatprep.subr.bf16.mxu0 %v3163_v12 }
 0x25d   :  { %2212 = vmatpush1.bf16.msra.mxu1 %v3141_v63  ;;  %2244 = vmatpush1.bf16.msra.mxu0 %v3168_v15 }
 0x25e   :  { %2246 = vmatprep.subr.bf16.mxu1 %v3025_v24  ;;  %2278 = vmatprep.subr.bf16.mxu0 %v3043_v44 }
 0x313   :  { %v811_v19 = vpop.f32.mrb[2].mxu1  ;;  %v882_v37 = vpop.f32.mrb[4].mxu0 }
 0x314   :  { %v2567_v38 = vadd.f32 %v811_v19, %v3214_v29  ;;  %v813_v41 = vpop.f32.mrb[3].mxu1  ;;  %v884_v42 = vpop.f32.mrb[5].mxu0  ;;  %v2583_v50 = vadd.f32 %v882_v37, %v3220_v52 }
 0x315   :  { %v2568_v43 = vadd.f32 %v813_v41, %v3216_v30  ;;  %v2584_v58 = vadd.f32 %v884_v42, %v3222_v56 }
 0x316   :  { %v2020_v45 = vmul.f32 -1.442695, %v2567_v38  ;;  %v2022_v60 = vmul.f32 -1.442695, %v2583_v50 }
 0x317   :  { %v2021_v46 = vmul.f32 -1.442695, %v2568_v43 }
 0x318   :  { %2658 = vpow2.f32 %v2020_v45 }
 0x319   :  { %2660 = vpow2.f32 %v2021_v46 }
 0x31a   :  { %2662 = vtanh.f32 %v2584_v58 }
 0x31b   :  { %2664 = vpow2.f32 %v2022_v60 }
 0x322   :  { %v2659_v61 = vpop.eup %2658 }
 0x323   :  { %v900_v62 = vadd.f32 1.0, %v2659_v61  ;;  %v2661_v5 = vpop.eup %2660 }
 0x324   :  { %v901_v6 = vadd.f32 1.0, %v2661_v5  ;;  %v2663_v8 = vpop.eup %2662 }
 0x325   :  { %2666 = vrcp.f32 %v900_v62  ;;  %v2665_v10 = vpop.eup %2664 }
 0x326   :  { %2668 = vrcp.f32 %v901_v6  ;;  %v902_v21 = vadd.f32 1.0, %v2665_v10 }
 0x328   :  { %2670 = vrcp.f32 %v902_v21 }
 0x32f   :  { %v2667_v13 = vpop.eup %2666 }
 0x330   :  { %v911_v14 = vmul.f32 %v2667_v13, %v2663_v8  ;;  %v2669_v18 = vpop.eup %2668 }
 0x331   :  { %v910_v22 = vmul.f32 %v2669_v18, %v3227_v26 }
 0x332   :  { %v2671_v27 = vpop.eup %2670 }
 0x333   :  { %v3269_v25 = vadd.f32 %v911_v14, %v910_v22 }
 0x335   :  { %2672 = vtanh.f32 %v3269_v25 }
 0x33f   :  { %v2673_v33 = vpop.eup %2672 }
 0x340   :  { %v914_v34 = vmul.f32 %v2673_v33, %v2671_v27 }
 0x342   :  { %916 = vst [vmem:[#allocation14 + $0x8] sm:$0xff] %v914_v34  ;;  %987 = vmatmul.mubr.f32.vlgmr.msra.gmra.mrb[4].mxu1 %v914_v34  ;;  %1058 = vmatmul.mubr.f32.vlgmr.msra.gmra.mrb[6].mxu0 %v914_v34 }
 0x343   :  { %2248 = vmatpush1.bf16.msra.mxu1 %v3029_v28  ;;  %2280 = vmatpush1.bf16.msra.mxu0 %v3056_v55 }
 0x344   :  { %2250 = vmatprep.subr.bf16.mxu1 %v3036_v35  ;;  %2282 = vmatprep.subr.bf16.mxu0 %v3061_v59 }
 0x345   :  { %1163 = vmatprep.mubr.f32.mxu1 %v2921_v0  ;;  %1234 = vmatprep.mubr.f32.mxu0 %v2921_v0 }
 0x347   :  { %2252 = vmatpush1.bf16.msra.mxu1 %v3040_v39  ;;  %2284 = vmatpush1.bf16.msra.mxu0 %v3078_v7 }
 0x348   :  { %2254 = vmatprep.subr.bf16.mxu1 %v3046_v47  ;;  %2286 = vmatprep.subr.bf16.mxu0 %v3081_v9 }
 0x34b   :  { %2256 = vmatpush1.bf16.msra.mxu1 %v3051_v51  ;;  %2288 = vmatpush1.bf16.msra.mxu0 %v3098_v20 }
 0x34c   :  { %2258 = vmatprep.subr.bf16.mxu1 %v3058_v57  ;;  %2290 = vmatprep.subr.bf16.mxu0 %v3101_v23 }
 0x34f   :  { %2260 = vmatpush1.bf16.msra.mxu1 %v3069_v2  ;;  %2292 = vmatpush1.bf16.msra.mxu0 %v3116_v36 }
 0x350   :  { %2262 = vmatprep.subr.bf16.mxu1 %v3074_v4  ;;  %2294 = vmatprep.subr.bf16.mxu0 %v3119_v40 }
 0x353   :  { %2264 = vmatpush1.bf16.msra.mxu1 %v3089_v16  ;;  %2296 = vmatpush1.bf16.msra.mxu0 %v3133_v53 }
 0x354   :  { %2266 = vmatprep.subr.bf16.mxu1 %v3094_v17  ;;  %2298 = vmatprep.subr.bf16.mxu0 %v3136_v54 }
 0x357   :  { %2268 = vmatpush1.bf16.msra.mxu1 %v3107_v31  ;;  %2300 = vmatpush1.bf16.msra.mxu0 %v3148_v1 }
 0x358   :  { %2270 = vmatprep.subr.bf16.mxu1 %v3112_v32  ;;  %2302 = vmatprep.subr.bf16.mxu0 %v3151_v3 }
 0x35b   :  { %2272 = vmatpush1.bf16.msra.mxu1 %v3124_v48  ;;  %2304 = vmatpush1.bf16.msra.mxu0 %v3160_v11 }
 0x35c   :  { %2274 = vmatprep.subr.bf16.mxu1 %v3129_v49  ;;  %2306 = vmatprep.subr.bf16.mxu0 %v3163_v12 }
 0x35f   :  { %2276 = vmatpush1.bf16.msra.mxu1 %v3141_v63  ;;  %2308 = vmatpush1.bf16.msra.mxu0 %v3168_v15 }
 0x360   :  { %2310 = vmatprep.subr.bf16.mxu1 %v3025_v24  ;;  %2342 = vmatprep.subr.bf16.mxu0 %v3043_v44 }
 0x415   :  { %v988_v26 = vpop.f32.mrb[4].mxu1  ;;  %v1059_v19 = vpop.f32.mrb[6].mxu0 }
 0x416   :  { %v2569_v37 = vadd.f32 %v988_v26, %v3214_v29  ;;  %v990_v38 = vpop.f32.mrb[5].mxu1  ;;  %v1061_v41 = vpop.f32.mrb[7].mxu0  ;;  %v2585_v46 = vadd.f32 %v1059_v19, %v3220_v52 }
 0x417   :  { %v2570_v42 = vadd.f32 %v990_v38, %v3216_v30  ;;  %v2586_v50 = vadd.f32 %v1061_v41, %v3222_v56 }
 0x418   :  { %v2023_v43 = vmul.f32 -1.442695, %v2569_v37  ;;  %v2025_v58 = vmul.f32 -1.442695, %v2585_v46 }
 0x419   :  { %v2024_v45 = vmul.f32 -1.442695, %v2570_v42 }
 0x41a   :  { %2674 = vpow2.f32 %v2023_v43 }
 0x41b   :  { %2676 = vpow2.f32 %v2024_v45 }
 0x41c   :  { %2678 = vtanh.f32 %v2586_v50 }
 0x41d   :  { %2680 = vpow2.f32 %v2025_v58 }
 0x424   :  { %v2675_v60 = vpop.eup %2674 }
 0x425   :  { %v1077_v61 = vadd.f32 1.0, %v2675_v60  ;;  %v2677_v62 = vpop.eup %2676 }
 0x426   :  { %v1078_v5 = vadd.f32 1.0, %v2677_v62  ;;  %v2679_v6 = vpop.eup %2678 }
 0x427   :  { %2682 = vrcp.f32 %v1077_v61  ;;  %v2681_v8 = vpop.eup %2680 }
 0x428   :  { %2684 = vrcp.f32 %v1078_v5  ;;  %v1079_v18 = vadd.f32 1.0, %v2681_v8 }
 0x42a   :  { %2686 = vrcp.f32 %v1079_v18 }
 0x431   :  { %v2683_v10 = vpop.eup %2682 }
 0x432   :  { %v1088_v13 = vmul.f32 %v2683_v10, %v2679_v6  ;;  %v2685_v14 = vpop.eup %2684 }
 0x433   :  { %v1087_v21 = vmul.f32 %v2685_v14, %v3269_v25 }
 0x434   :  { %v2687_v27 = vpop.eup %2686 }
 0x435   :  { %v3311_v22 = vadd.f32 %v1088_v13, %v1087_v21 }
 0x437   :  { %2688 = vtanh.f32 %v3311_v22 }
 0x441   :  { %v2689_v33 = vpop.eup %2688 }
 0x442   :  { %v1091_v34 = vmul.f32 %v2689_v33, %v2687_v27 }
 0x444   :  { %1093 = vst [vmem:[#allocation14 + $0x10] sm:$0xff] %v1091_v34  ;;  %1164 = vmatmul.mubr.f32.vlgmr.msra.gmra.mrb[6].mxu1 %v1091_v34  ;;  %1235 = vmatmul.mubr.f32.vlgmr.msra.gmra.mrb[8].mxu0 %v1091_v34 }
 0x445   :  { %2312 = vmatpush1.bf16.msra.mxu1 %v3029_v28  ;;  %2344 = vmatpush1.bf16.msra.mxu0 %v3056_v55 }
 0x446   :  { %2314 = vmatprep.subr.bf16.mxu1 %v3036_v35  ;;  %2346 = vmatprep.subr.bf16.mxu0 %v3061_v59 }
 0x447   :  { %1340 = vmatprep.mubr.f32.mxu1 %v2921_v0  ;;  %1411 = vmatprep.mubr.f32.mxu0 %v2921_v0 }
 0x449   :  { %2316 = vmatpush1.bf16.msra.mxu1 %v3040_v39  ;;  %2348 = vmatpush1.bf16.msra.mxu0 %v3078_v7 }
 0x44a   :  { %2318 = vmatprep.subr.bf16.mxu1 %v3046_v47  ;;  %2350 = vmatprep.subr.bf16.mxu0 %v3081_v9 }
 0x44d   :  { %2320 = vmatpush1.bf16.msra.mxu1 %v3051_v51  ;;  %2352 = vmatpush1.bf16.msra.mxu0 %v3098_v20 }
 0x44e   :  { %2322 = vmatprep.subr.bf16.mxu1 %v3058_v57  ;;  %2354 = vmatprep.subr.bf16.mxu0 %v3101_v23 }
 0x451   :  { %2324 = vmatpush1.bf16.msra.mxu1 %v3069_v2  ;;  %2356 = vmatpush1.bf16.msra.mxu0 %v3116_v36 }
 0x452   :  { %2326 = vmatprep.subr.bf16.mxu1 %v3074_v4  ;;  %2358 = vmatprep.subr.bf16.mxu0 %v3119_v40 }
 0x455   :  { %2328 = vmatpush1.bf16.msra.mxu1 %v3089_v16  ;;  %2360 = vmatpush1.bf16.msra.mxu0 %v3133_v53 }
 0x456   :  { %2330 = vmatprep.subr.bf16.mxu1 %v3094_v17  ;;  %2362 = vmatprep.subr.bf16.mxu0 %v3136_v54 }
 0x459   :  { %2332 = vmatpush1.bf16.msra.mxu1 %v3107_v31  ;;  %2364 = vmatpush1.bf16.msra.mxu0 %v3148_v1 }
 0x45a   :  { %2334 = vmatprep.subr.bf16.mxu1 %v3112_v32  ;;  %2366 = vmatprep.subr.bf16.mxu0 %v3151_v3 }
 0x45d   :  { %2336 = vmatpush1.bf16.msra.mxu1 %v3124_v48  ;;  %2368 = vmatpush1.bf16.msra.mxu0 %v3160_v11 }
 0x45e   :  { %2338 = vmatprep.subr.bf16.mxu1 %v3129_v49  ;;  %2370 = vmatprep.subr.bf16.mxu0 %v3163_v12 }
 0x461   :  { %2340 = vmatpush1.bf16.msra.mxu1 %v3141_v63  ;;  %2372 = vmatpush1.bf16.msra.mxu0 %v3168_v15 }
 0x462   :  { %2374 = vmatprep.subr.bf16.mxu1 %v3025_v24  ;;  %2406 = vmatprep.subr.bf16.mxu0 %v3043_v44 }
 0x517   :  { %v1165_v25 = vpop.f32.mrb[6].mxu1  ;;  %v1236_v26 = vpop.f32.mrb[8].mxu0 }
 0x518   :  { %v2571_v19 = vadd.f32 %v1165_v25, %v3214_v29  ;;  %v1167_v37 = vpop.f32.mrb[7].mxu1  ;;  %v1238_v38 = vpop.f32.mrb[9].mxu0  ;;  %v2587_v45 = vadd.f32 %v1236_v26, %v3220_v52 }
 0x519   :  { %v2572_v41 = vadd.f32 %v1167_v37, %v3216_v30  ;;  %v2588_v46 = vadd.f32 %v1238_v38, %v3222_v56 }
 0x51a   :  { %v2026_v42 = vmul.f32 -1.442695, %v2571_v19  ;;  %v2028_v50 = vmul.f32 -1.442695, %v2587_v45 }
 0x51b   :  { %v2027_v43 = vmul.f32 -1.442695, %v2572_v41 }
 0x51c   :  { %2690 = vpow2.f32 %v2026_v42 }
 0x51d   :  { %2692 = vpow2.f32 %v2027_v43 }
 0x51e   :  { %2694 = vtanh.f32 %v2588_v46 }
 0x51f   :  { %2696 = vpow2.f32 %v2028_v50 }
 0x526   :  { %v2691_v58 = vpop.eup %2690 }
 0x527   :  { %v1254_v60 = vadd.f32 1.0, %v2691_v58  ;;  %v2693_v61 = vpop.eup %2692 }
 0x528   :  { %v1255_v62 = vadd.f32 1.0, %v2693_v61  ;;  %v2695_v5 = vpop.eup %2694 }
 0x529   :  { %2698 = vrcp.f32 %v1254_v60  ;;  %v2697_v6 = vpop.eup %2696 }
 0x52a   :  { %2700 = vrcp.f32 %v1255_v62  ;;  %v1256_v14 = vadd.f32 1.0, %v2697_v6 }
 0x52c   :  { %2702 = vrcp.f32 %v1256_v14 }
 0x533   :  { %v2699_v8 = vpop.eup %2698 }
 0x534   :  { %v1265_v10 = vmul.f32 %v2699_v8, %v2695_v5  ;;  %v2701_v13 = vpop.eup %2700 }
 0x535   :  { %v1264_v18 = vmul.f32 %v2701_v13, %v3311_v22 }
 0x536   :  { %v2703_v27 = vpop.eup %2702 }
 0x537   :  { %v3353_v21 = vadd.f32 %v1265_v10, %v1264_v18 }
 0x539   :  { %2704 = vtanh.f32 %v3353_v21 }
 0x543   :  { %v2705_v33 = vpop.eup %2704 }
 0x544   :  { %v1268_v34 = vmul.f32 %v2705_v33, %v2703_v27 }
 0x546   :  { %1270 = vst [vmem:[#allocation14 + $0x18] sm:$0xff] %v1268_v34  ;;  %1341 = vmatmul.mubr.f32.vlgmr.msra.gmra.mrb[8].mxu1 %v1268_v34  ;;  %1412 = vmatmul.mubr.f32.vlgmr.msra.gmra.mrb[10].mxu0 %v1268_v34 }
 0x547   :  { %2376 = vmatpush1.bf16.msra.mxu1 %v3029_v28  ;;  %2408 = vmatpush1.bf16.msra.mxu0 %v3056_v55 }
 0x548   :  { %2378 = vmatprep.subr.bf16.mxu1 %v3036_v35  ;;  %2410 = vmatprep.subr.bf16.mxu0 %v3061_v59 }
 0x549   :  { %1517 = vmatprep.mubr.f32.mxu1 %v2921_v0  ;;  %1588 = vmatprep.mubr.f32.mxu0 %v2921_v0 }
 0x54b   :  { %2380 = vmatpush1.bf16.msra.mxu1 %v3040_v39  ;;  %2412 = vmatpush1.bf16.msra.mxu0 %v3078_v7 }
 0x54c   :  { %2382 = vmatprep.subr.bf16.mxu1 %v3046_v47  ;;  %2414 = vmatprep.subr.bf16.mxu0 %v3081_v9 }
 0x54f   :  { %2384 = vmatpush1.bf16.msra.mxu1 %v3051_v51  ;;  %2416 = vmatpush1.bf16.msra.mxu0 %v3098_v20 }
 0x550   :  { %2386 = vmatprep.subr.bf16.mxu1 %v3058_v57  ;;  %2418 = vmatprep.subr.bf16.mxu0 %v3101_v23 }
 0x553   :  { %2388 = vmatpush1.bf16.msra.mxu1 %v3069_v2  ;;  %2420 = vmatpush1.bf16.msra.mxu0 %v3116_v36 }
 0x554   :  { %2390 = vmatprep.subr.bf16.mxu1 %v3074_v4  ;;  %2422 = vmatprep.subr.bf16.mxu0 %v3119_v40 }
 0x557   :  { %2392 = vmatpush1.bf16.msra.mxu1 %v3089_v16  ;;  %2424 = vmatpush1.bf16.msra.mxu0 %v3133_v53 }
 0x558   :  { %2394 = vmatprep.subr.bf16.mxu1 %v3094_v17  ;;  %2426 = vmatprep.subr.bf16.mxu0 %v3136_v54 }
 0x55b   :  { %2396 = vmatpush1.bf16.msra.mxu1 %v3107_v31  ;;  %2428 = vmatpush1.bf16.msra.mxu0 %v3148_v1 }
 0x55c   :  { %2398 = vmatprep.subr.bf16.mxu1 %v3112_v32  ;;  %2430 = vmatprep.subr.bf16.mxu0 %v3151_v3 }
 0x55f   :  { %2400 = vmatpush1.bf16.msra.mxu1 %v3124_v48  ;;  %2432 = vmatpush1.bf16.msra.mxu0 %v3160_v11 }
 0x560   :  { %2402 = vmatprep.subr.bf16.mxu1 %v3129_v49  ;;  %2434 = vmatprep.subr.bf16.mxu0 %v3163_v12 }
 0x563   :  { %2404 = vmatpush1.bf16.msra.mxu1 %v3141_v63  ;;  %2436 = vmatpush1.bf16.msra.mxu0 %v3168_v15 }
 0x564   :  { %2438 = vmatprep.subr.bf16.mxu1 %v3025_v24  ;;  %2470 = vmatprep.subr.bf16.mxu0 %v3043_v44 }
 0x619   :  { %v1342_v22 = vpop.f32.mrb[8].mxu1  ;;  %v1413_v25 = vpop.f32.mrb[10].mxu0 }
 0x61a   :  { %v2573_v26 = vadd.f32 %v1342_v22, %v3214_v29  ;;  %v1344_v19 = vpop.f32.mrb[9].mxu1  ;;  %v1415_v37 = vpop.f32.mrb[11].mxu0  ;;  %v2589_v43 = vadd.f32 %v1413_v25, %v3220_v52 }
 0x61b   :  { %v2574_v38 = vadd.f32 %v1344_v19, %v3216_v30  ;;  %v2590_v45 = vadd.f32 %v1415_v37, %v3222_v56 }
 0x61c   :  { %v2029_v41 = vmul.f32 -1.442695, %v2573_v26  ;;  %v2031_v46 = vmul.f32 -1.442695, %v2589_v43 }
 0x61d   :  { %v2030_v42 = vmul.f32 -1.442695, %v2574_v38 }
 0x61e   :  { %2706 = vpow2.f32 %v2029_v41 }
 0x61f   :  { %2708 = vpow2.f32 %v2030_v42 }
 0x620   :  { %2710 = vtanh.f32 %v2590_v45 }
 0x621   :  { %2712 = vpow2.f32 %v2031_v46 }
 0x628   :  { %v2707_v50 = vpop.eup %2706 }
 0x629   :  { %v1431_v58 = vadd.f32 1.0, %v2707_v50  ;;  %v2709_v60 = vpop.eup %2708 }
 0x62a   :  { %v1432_v61 = vadd.f32 1.0, %v2709_v60  ;;  %v2711_v62 = vpop.eup %2710 }
 0x62b   :  { %2714 = vrcp.f32 %v1431_v58  ;;  %v2713_v5 = vpop.eup %2712 }
 0x62c   :  { %2716 = vrcp.f32 %v1432_v61  ;;  %v1433_v13 = vadd.f32 1.0, %v2713_v5 }
 0x62e   :  { %2718 = vrcp.f32 %v1433_v13 }
 0x635   :  { %v2715_v6 = vpop.eup %2714 }
 0x636   :  { %v1442_v8 = vmul.f32 %v2715_v6, %v2711_v62  ;;  %v2717_v10 = vpop.eup %2716 }
 0x637   :  { %v1441_v14 = vmul.f32 %v2717_v10, %v3353_v21 }
 0x638   :  { %v2719_v27 = vpop.eup %2718 }
 0x639   :  { %v3395_v18 = vadd.f32 %v1442_v8, %v1441_v14 }
 0x63b   :  { %2720 = vtanh.f32 %v3395_v18 }
 0x645   :  { %v2721_v33 = vpop.eup %2720 }
 0x646   :  { %v1445_v34 = vmul.f32 %v2721_v33, %v2719_v27 }
 0x648   :  { %1447 = vst [vmem:[#allocation14 + $0x20] sm:$0xff] %v1445_v34  ;;  %1518 = vmatmul.mubr.f32.vlgmr.msra.gmra.mrb[10].mxu1 %v1445_v34  ;;  %1589 = vmatmul.mubr.f32.vlgmr.msra.gmra.mrb[12].mxu0 %v1445_v34 }
 0x649   :  { %2440 = vmatpush1.bf16.msra.mxu1 %v3029_v28  ;;  %2472 = vmatpush1.bf16.msra.mxu0 %v3056_v55 }
 0x64a   :  { %2442 = vmatprep.subr.bf16.mxu1 %v3036_v35  ;;  %2474 = vmatprep.subr.bf16.mxu0 %v3061_v59 }
 0x64b   :  { %1694 = vmatprep.mubr.f32.mxu1 %v2921_v0  ;;  %1765 = vmatprep.mubr.f32.mxu0 %v2921_v0 }
 0x64d   :  { %2444 = vmatpush1.bf16.msra.mxu1 %v3040_v39  ;;  %2476 = vmatpush1.bf16.msra.mxu0 %v3078_v7 }
 0x64e   :  { %2446 = vmatprep.subr.bf16.mxu1 %v3046_v47  ;;  %2478 = vmatprep.subr.bf16.mxu0 %v3081_v9 }
 0x651   :  { %2448 = vmatpush1.bf16.msra.mxu1 %v3051_v51  ;;  %2480 = vmatpush1.bf16.msra.mxu0 %v3098_v20 }
 0x652   :  { %2450 = vmatprep.subr.bf16.mxu1 %v3058_v57  ;;  %2482 = vmatprep.subr.bf16.mxu0 %v3101_v23 }
 0x655   :  { %2452 = vmatpush1.bf16.msra.mxu1 %v3069_v2  ;;  %2484 = vmatpush1.bf16.msra.mxu0 %v3116_v36 }
 0x656   :  { %2454 = vmatprep.subr.bf16.mxu1 %v3074_v4  ;;  %2486 = vmatprep.subr.bf16.mxu0 %v3119_v40 }
 0x659   :  { %2456 = vmatpush1.bf16.msra.mxu1 %v3089_v16  ;;  %2488 = vmatpush1.bf16.msra.mxu0 %v3133_v53 }
 0x65a   :  { %2458 = vmatprep.subr.bf16.mxu1 %v3094_v17  ;;  %2490 = vmatprep.subr.bf16.mxu0 %v3136_v54 }
 0x65d   :  { %2460 = vmatpush1.bf16.msra.mxu1 %v3107_v31  ;;  %2492 = vmatpush1.bf16.msra.mxu0 %v3148_v1 }
 0x65e   :  { %2462 = vmatprep.subr.bf16.mxu1 %v3112_v32  ;;  %2494 = vmatprep.subr.bf16.mxu0 %v3151_v3 }
 0x661   :  { %2464 = vmatpush1.bf16.msra.mxu1 %v3124_v48  ;;  %2496 = vmatpush1.bf16.msra.mxu0 %v3160_v11 }
 0x662   :  { %2466 = vmatprep.subr.bf16.mxu1 %v3129_v49  ;;  %2498 = vmatprep.subr.bf16.mxu0 %v3163_v12 }
 0x665   :  { %2468 = vmatpush1.bf16.msra.mxu1 %v3141_v63  ;;  %2500 = vmatpush1.bf16.msra.mxu0 %v3168_v15 }
 0x666   :  { %2502 = vmatprep.subr.bf16.mxu1 %v3025_v24  ;;  %2534 = vmatprep.subr.bf16.mxu0 %v3043_v44 }
 0x71b   :  { %v1519_v21 = vpop.f32.mrb[10].mxu1  ;;  %v1590_v22 = vpop.f32.mrb[12].mxu0 }
 0x71c   :  { %v2575_v25 = vadd.f32 %v1519_v21, %v3214_v29  ;;  %v1521_v26 = vpop.f32.mrb[11].mxu1  ;;  %v1592_v19 = vpop.f32.mrb[13].mxu0  ;;  %v2591_v42 = vadd.f32 %v1590_v22, %v3220_v52 }
 0x71d   :  { %v2576_v37 = vadd.f32 %v1521_v26, %v3216_v30  ;;  %v2592_v43 = vadd.f32 %v1592_v19, %v3222_v56 }
 0x71e   :  { %v2032_v38 = vmul.f32 -1.442695, %v2575_v25  ;;  %v2034_v45 = vmul.f32 -1.442695, %v2591_v42 }
 0x71f   :  { %v2033_v41 = vmul.f32 -1.442695, %v2576_v37 }
 0x720   :  { %2722 = vpow2.f32 %v2032_v38 }
 0x721   :  { %2724 = vpow2.f32 %v2033_v41 }
 0x722   :  { %2726 = vtanh.f32 %v2592_v43 }
 0x723   :  { %2728 = vpow2.f32 %v2034_v45 }
 0x72a   :  { %v2723_v24 = vpop.eup %2722 }
 0x72b   :  { %v1608_v46 = vadd.f32 1.0, %v2723_v24  ;;  %v2725_v44 = vpop.eup %2724 }
 0x72c   :  { %v1609_v50 = vadd.f32 1.0, %v2725_v44  ;;  %v2727_v58 = vpop.eup %2726 }
 0x72d   :  { %2730 = vrcp.f32 %v1608_v46  ;;  %v2729_v60 = vpop.eup %2728 }
 0x72e   :  { %2732 = vrcp.f32 %v1609_v50  ;;  %v1610_v6 = vadd.f32 1.0, %v2729_v60 }
 0x730   :  { %2734 = vrcp.f32 %v1610_v6 }
 0x737   :  { %v2731_v61 = vpop.eup %2730 }
 0x738   :  { %v1619_v62 = vmul.f32 %v2731_v61, %v2727_v58  ;;  %v2733_v5 = vpop.eup %2732 }
 0x739   :  { %v1618_v8 = vmul.f32 %v2733_v5, %v3395_v18 }
 0x73a   :  { %v2735_v13 = vpop.eup %2734 }
 0x73b   :  { %v3437_v10 = vadd.f32 %v1619_v62, %v1618_v8 }
 0x73d   :  { %2736 = vtanh.f32 %v3437_v10 }
 0x747   :  { %v2737_v14 = vpop.eup %2736 }
 0x748   :  { %v1622_v27 = vmul.f32 %v2737_v14, %v2735_v13 }
 0x74a   :  { %1624 = vst [vmem:[#allocation14 + $0x28] sm:$0xff] %v1622_v27  ;;  %1695 = vmatmul.mubr.f32.vlgmr.msra.gmra.mrb[12].mxu1 %v1622_v27  ;;  %1766 = vmatmul.mubr.f32.vlgmr.msra.gmra.mrb[14].mxu0 %v1622_v27 }
 0x74b   :  { %2504 = vmatpush1.bf16.msra.mxu1 %v3029_v28  ;;  %2536 = vmatpush1.bf16.msra.mxu0 %v3056_v55 }
 0x74c   :  { %2506 = vmatprep.subr.bf16.mxu1 %v3036_v35  ;;  %2538 = vmatprep.subr.bf16.mxu0 %v3061_v59 }
 0x74d   :  { %1871 = vmatprep.mubr.f32.mxu1 %v2921_v0  ;;  %1942 = vmatprep.mubr.f32.mxu0 %v2921_v0 }
 0x74f   :  { %2508 = vmatpush1.bf16.msra.mxu1 %v3040_v39  ;;  %2540 = vmatpush1.bf16.msra.mxu0 %v3078_v7 }
 0x750   :  { %2510 = vmatprep.subr.bf16.mxu1 %v3046_v47  ;;  %2542 = vmatprep.subr.bf16.mxu0 %v3081_v9 }
 0x753   :  { %2512 = vmatpush1.bf16.msra.mxu1 %v3051_v51  ;;  %2544 = vmatpush1.bf16.msra.mxu0 %v3098_v20 }
 0x754   :  { %2514 = vmatprep.subr.bf16.mxu1 %v3058_v57  ;;  %2546 = vmatprep.subr.bf16.mxu0 %v3101_v23 }
 0x757   :  { %2516 = vmatpush1.bf16.msra.mxu1 %v3069_v2  ;;  %2548 = vmatpush1.bf16.msra.mxu0 %v3116_v36 }
 0x758   :  { %2518 = vmatprep.subr.bf16.mxu1 %v3074_v4  ;;  %2550 = vmatprep.subr.bf16.mxu0 %v3119_v40 }
 0x75b   :  { %2520 = vmatpush1.bf16.msra.mxu1 %v3089_v16  ;;  %2552 = vmatpush1.bf16.msra.mxu0 %v3133_v53 }
 0x75c   :  { %2522 = vmatprep.subr.bf16.mxu1 %v3094_v17  ;;  %2554 = vmatprep.subr.bf16.mxu0 %v3136_v54 }
 0x75f   :  { %2524 = vmatpush1.bf16.msra.mxu1 %v3107_v31  ;;  %2556 = vmatpush1.bf16.msra.mxu0 %v3148_v1 }
 0x760   :  { %2526 = vmatprep.subr.bf16.mxu1 %v3112_v32  ;;  %2558 = vmatprep.subr.bf16.mxu0 %v3151_v3 }
 0x763   :  { %2528 = vmatpush1.bf16.msra.mxu1 %v3124_v48  ;;  %2560 = vmatpush1.bf16.msra.mxu0 %v3160_v11 }
 0x764   :  { %2530 = vmatprep.subr.bf16.mxu1 %v3129_v49  ;;  %2562 = vmatprep.subr.bf16.mxu0 %v3163_v12 }
 0x767   :  { %2532 = vmatpush1.bf16.msra.mxu1 %v3141_v63  ;;  %2564 = vmatpush1.bf16.msra.mxu0 %v3168_v15 }
 0x81d   :  { %v1696_v0 = vpop.f32.mrb[12].mxu1  ;;  %v1767_v28 = vpop.f32.mrb[14].mxu0 }
 0x81e   :  { %v2577_v35 = vadd.f32 %v1696_v0, %v3214_v29  ;;  %v1698_v39 = vpop.f32.mrb[13].mxu1  ;;  %v1769_v47 = vpop.f32.mrb[15].mxu0  ;;  %v2593_v59 = vadd.f32 %v1767_v28, %v3220_v52 }
 0x81f   :  { %v2578_v51 = vadd.f32 %v1698_v39, %v3216_v30  ;;  %v2594_v2 = vadd.f32 %v1769_v47, %v3222_v56 }
 0x820   :  { %v2035_v55 = vmul.f32 -1.442695, %v2577_v35  ;;  %v2037_v4 = vmul.f32 -1.442695, %v2593_v59 }
 0x821   :  { %v2036_v57 = vmul.f32 -1.442695, %v2578_v51 }
 0x822   :  { %2738 = vpow2.f32 %v2035_v55 }
 0x823   :  { %2740 = vpow2.f32 %v2036_v57 }
 0x824   :  { %2742 = vtanh.f32 %v2594_v2 }
 0x825   :  { %2744 = vpow2.f32 %v2037_v4 }
 0x82c   :  { %v2739_v7 = vpop.eup %2738 }
 0x82d   :  { %v1785_v9 = vadd.f32 1.0, %v2739_v7  ;;  %v2741_v16 = vpop.eup %2740 }
 0x82e   :  { %v1786_v17 = vadd.f32 1.0, %v2741_v16  ;;  %v2743_v20 = vpop.eup %2742 }
 0x82f   :  { %2746 = vrcp.f32 %v1785_v9  ;;  %v2745_v23 = vpop.eup %2744 }
 0x830   :  { %2748 = vrcp.f32 %v1786_v17  ;;  %v1787_v40 = vadd.f32 1.0, %v2745_v23 }
 0x832   :  { %2750 = vrcp.f32 %v1787_v40 }
 0x839   :  { %v2747_v31 = vpop.eup %2746 }
 0x83a   :  { %v1796_v32 = vmul.f32 %v2747_v31, %v2743_v20  ;;  %v2749_v36 = vpop.eup %2748 }
 0x83b   :  { %v1795_v48 = vmul.f32 %v2749_v36, %v3437_v10 }
 0x83c   :  { %v2751_v53 = vpop.eup %2750 }
 0x83d   :  { %v1797_v49 = vadd.f32 %v1796_v32, %v1795_v48 }
 0x83f   :  { %2752 = vtanh.f32 %v1797_v49 }
 0x849   :  { %v2753_v54 = vpop.eup %2752 }
 0x84a   :  { %v1799_v63 = vmul.f32 %v2753_v54, %v2751_v53 }
 0x84c   :  { %1801 = vst [vmem:[#allocation14 + $0x30] sm:$0xff] %v1799_v63  ;;  %1872 = vmatmul.mubr.f32.vlgmr.msra.gmra.mrb[14].mxu1 %v1799_v63  ;;  %1943 = vmatmul.mubr.f32.vlgmr.msra.gmra.mrb[16].mxu0 %v1799_v63 }
 0x91f   :  { %v1873_v1 = vpop.f32.mrb[14].mxu1  ;;  %v1944_v3 = vpop.f32.mrb[16].mxu0 }
 0x920   :  { %v2579_v11 = vadd.f32 %v1873_v1, %v3214_v29  ;;  %v1875_v12 = vpop.f32.mrb[15].mxu1  ;;  %v1946_v15 = vpop.f32.mrb[17].mxu0  ;;  %v2595_v21 = vadd.f32 %v1944_v3, %v3220_v52 }
 0x921   :  { %v2580_v18 = vadd.f32 %v1875_v12, %v3216_v30  ;;  %v2596_v22 = vadd.f32 %v1946_v15, %v3222_v56 }
 0x922   :  { %v2038_v33 = vmul.f32 -1.442695, %v2579_v11  ;;  %v2040_v25 = vmul.f32 -1.442695, %v2595_v21 }
 0x923   :  { %v2039_v34 = vmul.f32 -1.442695, %v2580_v18 }
 0x924   :  { %2754 = vpow2.f32 %v2038_v33 }
 0x925   :  { %2756 = vpow2.f32 %v2039_v34 }
 0x926   :  { %2758 = vtanh.f32 %v2596_v22 }
 0x927   :  { %2760 = vpow2.f32 %v2040_v25 }
 0x92e   :  { %v2755_v26 = vpop.eup %2754 }
 0x92f   :  { %v1962_v19 = vadd.f32 1.0, %v2755_v26  ;;  %v2757_v37 = vpop.eup %2756 }
 0x930   :  { %v1963_v29 = vadd.f32 1.0, %v2757_v37  ;;  %v2759_v38 = vpop.eup %2758 }
 0x931   :  { %2762 = vrcp.f32 %v1962_v19  ;;  %v2761_v41 = vpop.eup %2760 }
 0x932   :  { %2764 = vrcp.f32 %v1963_v29  ;;  %v1964_v45 = vadd.f32 1.0, %v2761_v41 }
 0x934   :  { %2766 = vrcp.f32 %v1964_v45 }
 0x93b   :  { %v2763_v30 = vpop.eup %2762 }
 0x93c   :  { %v1973_v42 = vmul.f32 %v2763_v30, %v2759_v38  ;;  %v2765_v43 = vpop.eup %2764 }
 0x93d   :  { %v1972_v24 = vmul.f32 %v2765_v43, %v1797_v49 }
 0x93e   :  { %v2767_v52 = vpop.eup %2766 }
 0x93f   :  { %v1974_v46 = vadd.f32 %v1973_v42, %v1972_v24 }
 0x941   :  { %2768 = vtanh.f32 %v1974_v46 }
 0x94b   :  { %v2769_v56 = vpop.eup %2768 }
 0x94c   :  { %v1976_v44 = vmul.f32 %v2769_v56, %v2767_v52 }
 0x94e   :  { %1978 = vst [vmem:[#allocation14 + $0x38] sm:$0xff] %v1976_v44 }
 0x94f   :  { %2891 = shalt.err (!%p2888_p2)
}
 0x950   :  { %s2892_s16 = scalar_lea.hbm %s3502_s6, 1024 }
 0x951   :  { %p2893_p3 = scmp.ne.s32.totalorder %s3502_s6, %s2892_s16  ;;  %p2896_p4 = scmp.lt.u32.totalorder %s2892_s16, %s3502_s6 }
 0x953   :  { %p2898_p5 = pnand %p2896_p4, %p2893_p3 }
 0x955   :  { %2901 = shalt.err (!%p2898_p5)
}
 0x956   :  { %1992 = dma.vmem_to_hbm [thread:$0]  %s1987_s12, 1024, %s3502_s6, [#allocation7], %s2913_s3, %s2913_s3, %s2914_s24  }
 0x957   :  { %2908 = dma.done.wait [#allocation7], 1024  }
 0x958   :  { %2909 = vsyncadd [#allocation7], 4294966272 }
 0x959   :  { %1996 = vsyncpa [#allocation6], 1 }
 0x95a   :  { %1997 = vsyncpa [#allocation9], 1 }
 0x95b   :  { %1998 = vsyncpa [#allocation12], 1 }
 0x95c   :  { %1999 = vsyncpa [#allocation7], 1 }

</bundles_post_ra>
